<compile_context>
chip_gen: v7x
topology: tpu7x:2x2x1
jax: 0.10.0
libtpu: 0.0.40
codegen_flags: <defaults>
</compile_context>

<pallas_src>
import functools

import numpy as np
import jax
import jax.numpy as jnp
from jax.experimental import pallas as pl
from jax.experimental.pallas import tpu as pltpu


_SQRT_HALF = 0.7071067811865476
_BN_EPS = 1e-5
_VMEM_LIMIT = 48 * 1024 * 1024          # safe on v5e/v6e (128 MiB) and v7x (64 MiB)


def _round_up(x, m):
    return (x + m - 1) // m * m


def _gelu_exact(y):
    # PyTorch F.gelu default (exact, erf-based).
    # TODO(synk): on v5e, jax.nn.gelu(approximate=True) (tanh -> EUP slot) is
    # cheaper if parity tolerance allows; kept exact for PyTorch parity.
    return 0.5 * y * (1.0 + jax.lax.erf(y * _SQRT_HALF))


# --------------------- single-sweep (VMEM-resident) path -------------------- #

def _fused_kernel(x_ref, w_ref, gb_ref, o_ref, *, inv_count):
    """Linear -> BN(batch stats) -> GELU for one channel tile, whole M resident.

    x_ref: (M, Cin) f32   w_ref: (Cin, tf) f32   gb_ref: (2, tf) f32 [gamma; beta]
    o_ref: (M, tf) f32
    """
    x_bf = x_ref[...].astype(jnp.bfloat16)            # in-kernel cast (free)
    w_bf = w_ref[...].astype(jnp.bfloat16)
    y = jnp.dot(x_bf, w_bf, preferred_element_type=jnp.float32)     # (M, tf)

    s = jnp.sum(y, axis=0, keepdims=True)                           # (1, tf)
    q = jnp.sum(y * y, axis=0, keepdims=True)
    mean = s * inv_count
    var = jnp.maximum(q * inv_count - mean * mean, 0.0)             # clamp
    scale = gb_ref[0:1, :] * jax.lax.rsqrt(var + _BN_EPS)
    shift = gb_ref[1:2, :] - mean * scale

    o_ref[...] = _gelu_exact(y * scale + shift)


# --------------------- large-problem two-sweep path ------------------------- #

def _stats_kernel(x_ref, w_ref, sum_ref, ssq_ref, *, tf):
    """Accumulate per-channel sum / sum-of-squares of y = x @ w for ALL channel
    tiles in one M sweep.  sum_ref / ssq_ref are (1, f_pad) resident outputs."""
    m = pl.program_id(0)
    f = pl.program_id(1)

    @pl.when(jnp.logical_and(m == 0, f == 0))
    def _():
        sum_ref[...] = jnp.zeros_like(sum_ref)
        ssq_ref[...] = jnp.zeros_like(ssq_ref)

    y = jnp.dot(x_ref[...].astype(jnp.bfloat16),
                w_ref[...].astype(jnp.bfloat16),
                preferred_element_type=jnp.float32)                 # (tm, tf)

    off = pl.multiple_of(f * tf, 128)
    sum_ref[:, pl.ds(off, tf)] += jnp.sum(y, axis=0, keepdims=True)
    ssq_ref[:, pl.ds(off, tf)] += jnp.sum(y * y, axis=0, keepdims=True)


def _apply_kernel(x_ref, w_ref, ss_ref, o_ref):
    """y = x @ w; out = gelu(y * scale + shift) with precomputed scale/shift."""
    y = jnp.dot(x_ref[...].astype(jnp.bfloat16),
                w_ref[...].astype(jnp.bfloat16),
                preferred_element_type=jnp.float32)                 # (tm, tf)
    o_ref[...] = _gelu_exact(y * ss_ref[0:1, :] + ss_ref[1:2, :])


# ------------------------------- wrapper ------------------------------------ #

def single_mlp_forward(x, w, bias, gamma, beta, *, tm=512,
                       single_sweep_budget=24 * 1024 * 1024):
    """x: (B, N, Cin) f32 -> (B, N, F_out) f32  (Linear -> BN1d(train) -> GELU).

    `bias` is accepted for nn.Linear API parity but unused: training-mode BN
    subtracts the per-channel batch mean, which cancels the bias exactly.
    """
    # TODO(synk): batch_norm=False branch (plain Linear + bias, no GELU) is not
    # implemented here.
    del bias
    B, N, Cin = x.shape
    F_out = w.shape[1]
    M = B * N

    f_pad = _round_up(F_out, 128)                  # lane-dense channel dim
    tf = 256 if f_pad % 256 == 0 else 128          # fill the 256-wide MXU when possible
    n_f = f_pad // tf

    x2 = x.reshape(M, Cin).astype(jnp.float32)     # bf16 cast happens in-kernel

    if f_pad != F_out:                             # tiny weight-side pads only
        w_p = jnp.pad(w, ((0, 0), (0, f_pad - F_out)))
        g_p = jnp.pad(gamma.reshape(-1), (0, f_pad - F_out), constant_values=1.0)
        b_p = jnp.pad(beta.reshape(-1), (0, f_pad - F_out))
    else:
        w_p, g_p, b_p = w, gamma.reshape(-1), beta.reshape(-1)
    w_p = w_p.astype(jnp.float32)
    gb = jnp.stack([g_p, b_p], axis=0).astype(jnp.float32)          # (2, f_pad)

    inv_count = 1.0 / M

    # VMEM estimate for the single-sweep path (lane-padded x, double-buffered
    # operands, a few f32 y-sized temporaries).  Conservative vs v7x's 64 MiB.
    x_vmem = M * _round_up(Cin, 128) * 4
    w_vmem = _round_up(Cin, 8) * tf * 4
    y_vmem = M * tf * 4
    single_sweep_bytes = 2 * (x_vmem + w_vmem + y_vmem) + 3 * y_vmem

    if single_sweep_bytes <= single_sweep_budget:
        # ---- fast path: whole M resident, one fused sweep per channel tile ----
        out = pl.pallas_call(
            functools.partial(_fused_kernel, inv_count=inv_count),
            out_shape=jax.ShapeDtypeStruct((M, f_pad), jnp.float32),
            grid=(n_f,),
            in_specs=[
                pl.BlockSpec((M, Cin), lambda f: (0, 0)),     # x resident, read once
                pl.BlockSpec((Cin, tf), lambda f: (0, f)),
                pl.BlockSpec((2, tf), lambda f: (0, f)),
            ],
            out_specs=pl.BlockSpec((M, tf), lambda f: (0, f)),
            compiler_params=pltpu.CompilerParams(
                dimension_semantics=("parallel",),
                vmem_limit_bytes=_VMEM_LIMIT),
        )(x2, w_p, gb)
    else:
        # ---- large-problem path: stats sweep + normalize sweep ----
        m_pad = _round_up(M, tm)
        x2p = jnp.pad(x2, ((0, m_pad - M), (0, 0))) if m_pad != M else x2
        n_m = m_pad // tm

        # Pass 1: per-channel sum / sum-of-squares; x streamed exactly once
        # (x block index depends only on m, f is the inner grid axis).
        sums, ssqs = pl.pallas_call(
            functools.partial(_stats_kernel, tf=tf),
            out_shape=(jax.ShapeDtypeStruct((1, f_pad), jnp.float32),
                       jax.ShapeDtypeStruct((1, f_pad), jnp.float32)),
            grid=(n_m, n_f),
            in_specs=[
                pl.BlockSpec((tm, Cin), lambda m, f: (m, 0)),
                pl.BlockSpec((Cin, tf), lambda m, f: (0, f)),
            ],
            out_specs=(pl.BlockSpec((1, f_pad), lambda m, f: (0, 0)),
                       pl.BlockSpec((1, f_pad), lambda m, f: (0, 0))),
            compiler_params=pltpu.CompilerParams(
                dimension_semantics=("arbitrary", "arbitrary"),
                vmem_limit_bytes=_VMEM_LIMIT),
        )(x2p, w_p)

        # Fold mean/var/gamma/beta into one scale/shift pair (tiny, plain JAX).
        mean = sums * inv_count
        var = jnp.maximum(ssqs * inv_count - mean * mean, 0.0)
        scale = gb[0:1, :] * jax.lax.rsqrt(var + _BN_EPS)
        shift = gb[1:2, :] - mean * scale
        ss = jnp.concatenate([scale, shift], axis=0)                 # (2, f_pad)

        # Pass 2: recompute y tile-by-tile, normalize + GELU.  Fully parallel
        # on both axes (m-axis sharding keeps v7x's second TC busy even when
        # F_out fits a single channel tile).
        out = pl.pallas_call(
            _apply_kernel,
            out_shape=jax.ShapeDtypeStruct((m_pad, f_pad), jnp.float32),
            grid=(n_m, n_f),
            in_specs=[
                pl.BlockSpec((tm, Cin), lambda m, f: (m, 0)),
                pl.BlockSpec((Cin, tf), lambda m, f: (0, f)),
                pl.BlockSpec((2, tf), lambda m, f: (0, f)),
            ],
            out_specs=pl.BlockSpec((tm, tf), lambda m, f: (m, f)),
            compiler_params=pltpu.CompilerParams(
                dimension_semantics=("parallel", "parallel"),
                vmem_limit_bytes=_VMEM_LIMIT),
        )(x2p, w_p, ss)
        if m_pad != M:
            out = out[:M]

    if f_pad != F_out:
        out = out[:, :F_out]
    return out.reshape(B, N, F_out)


# --------------------------- pure-JAX reference ----------------------------- #

def reference_single_mlp(x, w, bias, gamma, beta):
    # Same bf16 rounding of the matmul operands as the kernel, f32 accumulation.
    xb = x.astype(jnp.bfloat16).astype(jnp.float32)
    wb = w.astype(jnp.bfloat16).astype(jnp.float32)
    y = jnp.einsum("bnc,cf->bnf", xb, wb) + bias
    mean = jnp.mean(y, axis=(0, 1), keepdims=True)
    var = jnp.mean(jnp.square(y - mean), axis=(0, 1), keepdims=True)
    yn = (y - mean) * jax.lax.rsqrt(var + _BN_EPS) * gamma + beta
    return jax.nn.gelu(yn, approximate=False)


# --------------------------------- main ------------------------------------- #

if __name__ == "__main__":
    key = jax.random.PRNGKey(0)
    k_x, k_w, k_b, k_g, k_beta = jax.random.split(key, 5)

    B, N, IN_FEATS, OUT_FEATS = 2, 256, 32, 64

    x = jax.random.normal(k_x, (B, N, IN_FEATS), jnp.float32)

    # nn.Linear default-style uniform init.
    lim = 1.0 / float(np.sqrt(IN_FEATS))
    w = jax.random.uniform(k_w, (IN_FEATS, OUT_FEATS), jnp.float32, -lim, lim)
    bias = jax.random.uniform(k_b, (OUT_FEATS,), jnp.float32, -lim, lim)
    # PyTorch BatchNorm1d init is gamma=1, beta=0; perturb to exercise the path.
    gamma = 1.0 + 0.1 * jax.random.normal(k_g, (OUT_FEATS,), jnp.float32)
    beta = 0.1 * jax.random.normal(k_beta, (OUT_FEATS,), jnp.float32)

    ref = reference_single_mlp(x, w, bias, gamma, beta)

    # Fast path: whole problem VMEM-resident, single fused sweep.
    out = single_mlp_forward(x, w, bias, gamma, beta)
    jax.block_until_ready(out)
    assert out.shape == (B, N, OUT_FEATS)
    np.testing.assert_allclose(np.asarray(out), np.asarray(ref),
                               rtol=2e-3, atol=2e-3)

    # Large-problem path: force the two-call (stats + normalize) pipeline.
    out2 = single_mlp_forward(x, w, bias, gamma, beta,
                              tm=256, single_sweep_budget=0)
    jax.block_until_ready(out2)
    np.testing.assert_allclose(np.asarray(out2), np.asarray(ref),
                               rtol=2e-3, atol=2e-3)

    print("KERNEL_OK")
</pallas_src>

<mosaic_0001>
module attributes {stable_mosaic.version = 11 : i64} {
  func.func @_fused_kernel(%arg0: i32, %arg1: memref<512x32xf32, #tpu.memory_space<vmem>>, %arg2: memref<32x128xf32, #tpu.memory_space<vmem>>, %arg3: memref<2x128xf32, #tpu.memory_space<vmem>>, %arg4: memref<512x128xf32, #tpu.memory_space<vmem>>) attributes {dimension_semantics = [#tpu.dimension_semantics<parallel>], iteration_bounds = array<i64: 1>, scalar_prefetch = 0 : i64, scratch_operands = 0 : i64, tpu.core_type = #tpu.core_type<tc>, window_params = [{pipeline_mode = #tpu.pipeline_mode<synchronous>, transform_indices = @transform_0, window_bounds = array<i64: 512, 32>}, {transform_indices = @transform_1, window_bounds = array<i64: 32, 128>}, {transform_indices = @transform_2, window_bounds = array<i64: 2, 128>}, {transform_indices = @transform_3, window_bounds = array<i64: 512, 128>}]} {
    %c0 = arith.constant 0 : index
    %c0_0 = arith.constant 0 : index
    %0 = vector.load %arg1[%c0, %c0_0] : memref<512x32xf32, #tpu.memory_space<vmem>>, vector<512x32xf32>
    %1 = arith.truncf %0 : vector<512x32xf32> to vector<512x32xbf16>
    %c0_1 = arith.constant 0 : index
    %c0_2 = arith.constant 0 : index
    %2 = vector.load %arg2[%c0_1, %c0_2] : memref<32x128xf32, #tpu.memory_space<vmem>>, vector<32x128xf32>
    %3 = arith.truncf %2 : vector<32x128xf32> to vector<32x128xbf16>
    %cst = arith.constant dense<0.000000e+00> : vector<512x128xf32>
    %4 = tpu.matmul %1, %3, %cst {dimension_numbers = #tpu.dot_dimension_numbers<[1], [0], [0], [1], [0, 0, 1, 1], [], []>} : vector<512x32xbf16>, vector<32x128xbf16>, vector<512x128xf32> -> vector<512x128xf32>
    %cst_3 = arith.constant dense<0.000000e+00> : vector<128xf32>
    %5 = vector.multi_reduction <add>, %4, %cst_3 [0] : vector<512x128xf32> to vector<128xf32>
    %6 = vector.shape_cast %5 : vector<128xf32> to vector<1x128xf32>
    %7 = arith.mulf %4, %4 : vector<512x128xf32>
    %cst_4 = arith.constant dense<0.000000e+00> : vector<128xf32>
    %8 = vector.multi_reduction <add>, %7, %cst_4 [0] : vector<512x128xf32> to vector<128xf32>
    %9 = vector.shape_cast %8 : vector<128xf32> to vector<1x128xf32>
    %cst_5 = arith.constant 0.001953125 : f32
    %10 = vector.broadcast %cst_5 : f32 to vector<1x128xf32>
    %11 = arith.mulf %6, %10 : vector<1x128xf32>
    %cst_6 = arith.constant 0.001953125 : f32
    %12 = vector.broadcast %cst_6 : f32 to vector<1x128xf32>
    %13 = arith.mulf %9, %12 : vector<1x128xf32>
    %14 = arith.mulf %11, %11 : vector<1x128xf32>
    %15 = arith.subf %13, %14 : vector<1x128xf32>
    %cst_7 = arith.constant 0.000000e+00 : f32
    %16 = vector.broadcast %cst_7 : f32 to vector<1x128xf32>
    %17 = arith.maximumf %15, %16 : vector<1x128xf32>
    %c0_8 = arith.constant 0 : index
    %c0_9 = arith.constant 0 : index
    %18 = vector.load %arg3[%c0_8, %c0_9] : memref<2x128xf32, #tpu.memory_space<vmem>>, vector<1x128xf32>
    %cst_10 = arith.constant 9.99999974E-6 : f32
    %19 = vector.broadcast %cst_10 : f32 to vector<1x128xf32>
    %20 = arith.addf %17, %19 : vector<1x128xf32>
    %21 = math.rsqrt %20 : vector<1x128xf32>
    %22 = arith.mulf %18, %21 : vector<1x128xf32>
    %c1 = arith.constant 1 : index
    %c0_11 = arith.constant 0 : index
    %23 = vector.load %arg3[%c1, %c0_11] : memref<2x128xf32, #tpu.memory_space<vmem>>, vector<1x128xf32>
    %24 = arith.mulf %11, %22 : vector<1x128xf32>
    %25 = arith.subf %23, %24 : vector<1x128xf32>
    %26 = vector.broadcast %22 : vector<1x128xf32> to vector<512x128xf32>
    %27 = arith.mulf %4, %26 : vector<512x128xf32>
    %28 = vector.broadcast %25 : vector<1x128xf32> to vector<512x128xf32>
    %29 = arith.addf %27, %28 : vector<512x128xf32>
    %cst_12 = arith.constant 5.000000e-01 : f32
    %30 = vector.broadcast %cst_12 : f32 to vector<512x128xf32>
    %31 = arith.mulf %30, %29 : vector<512x128xf32>
    %cst_13 = arith.constant 0.707106769 : f32
    %32 = vector.broadcast %cst_13 : f32 to vector<512x128xf32>
    %33 = arith.mulf %29, %32 : vector<512x128xf32>
    %34 = math.erf %33 : vector<512x128xf32>
    %cst_14 = arith.constant 1.000000e+00 : f32
    %35 = vector.broadcast %cst_14 : f32 to vector<512x128xf32>
    %36 = arith.addf %35, %34 : vector<512x128xf32>
    %37 = arith.mulf %31, %36 : vector<512x128xf32>
    %c0_15 = arith.constant 0 : index
    %c0_16 = arith.constant 0 : index
    %38 = vector.load %arg4[%c0_15, %c0_16] : memref<512x128xf32, #tpu.memory_space<vmem>>, vector<512x128xf32>
    tpu.vector_store %arg4[%c0_15, %c0_16], %37 {strides = array<i32>} : memref<512x128xf32, #tpu.memory_space<vmem>>, vector<512x128xf32>,
    return
  }
  func.func @transform_0(%arg0: i32) -> (i32, i32) {
    %c0_i32 = arith.constant 0 : i32
    %c0_i32_0 = arith.constant 0 : i32
    %c0_i32_1 = arith.constant 0 : i32
    return %c0_i32, %c0_i32_0 : i32, i32
  }
  func.func @transform_1(%arg0: i32) -> (i32, i32) {
    %c0_i32 = arith.constant 0 : i32
    %c0_i32_0 = arith.constant 0 : i32
    return %c0_i32, %arg0 : i32, i32
  }
  func.func @transform_2(%arg0: i32) -> (i32, i32) {
    %c0_i32 = arith.constant 0 : i32
    %c0_i32_0 = arith.constant 0 : i32
    return %c0_i32, %arg0 : i32, i32
  }
  func.func @transform_3(%arg0: i32) -> (i32, i32) {
    %c0_i32 = arith.constant 0 : i32
    %c0_i32_0 = arith.constant 0 : i32
    return %c0_i32, %arg0 : i32, i32
  }
}

</mosaic_0001>

<bundles_post_ra>
// kernel: tpu_custom_call.1
= control target key start
LH: loop header
LB: loop body
LE: loop exit
PB: predicated region body
PF: predicated region fallthrough
CT: control target
= control target key end

     0   :  { %vm118_vm0 = vcmask 261120   ;;  %s2957_s0 = inlined_call_operand.vmem [shape: f32[512,32], index: 0, kind: input, shape index: {}]   ;;  %s2958_s1 = inlined_call_operand.vmem [shape: f32[32,128], index: 1, kind: input, shape index: {}]   ;;  %s2959_s2 = inlined_call_operand.vmem [shape: f32[2,128], index: 2, kind: input, shape index: {}]   ;;  %s2960_s3 = inlined_call_operand.hbm [shape: f32[512,128], index: 3, kind: output, shape index: {}]  }
   0x1   :  { %v112_v0 = vld [vmem:[%s2958_s1] sm:$0xff]  ;;  %v113_v1 = vld [vmem:[%s2958_s1 + $0x8] sm:$0xff]  ;;  %v114_v2 = vld [vmem:[%s2958_s1 + $0x10] sm:$0xff] }
   0x2   :  { %v116_v3 = vpack.c.bf16 %v113_v1, %v112_v0  ;;  %v115_v4 = vld [vmem:[%s2958_s1 + $0x18] sm:$0xff]  ;;  %v16_v5 = vld [vmem:[%s2957_s0] sm:$0xff]  ;;  %v17_v6 = vld [vmem:[%s2957_s0 + $0x8] sm:$0xff] }
   0x3   :  { %v117_v7 = vpack.c.bf16 %v115_v4, %v114_v2  ;;  %v80_v8 = vpack.c.bf16 %v17_v6, %v16_v5  ;;  %v18_v9 = vld [vmem:[%s2957_s0 + $0x10] sm:$0xff]  ;;  %v19_v10 = vld [vmem:[%s2957_s0 + $0x18] sm:$0xff]  ;;  %v20_v11 = vld [vmem:[%s2957_s0 + $0x20] sm:$0xff] }
   0x4   :  { %1320 = vmatprep.subr.bf16.mxu0 %v116_v3  ;;  %1388 = vmatprep.subr.bf16.mxu1 %v116_v3  ;;  %v21_v12 = vld [vmem:[%s2957_s0 + $0x28] sm:$0xff]  ;;  %v81_v13 = vpack.c.bf16 %v19_v10, %v18_v9  ;;  %v22_v15 = vld [vmem:[%s2957_s0 + $0x30] sm:$0xff]  ;;  %v23_v16 = vld [vmem:[%s2957_s0 + $0x38] sm:$0xff] }
   0x5   :  { %1321 = vmatpush3.bf16.msra.mxu0 %v116_v3  ;;  %1324 = vmatprep.mubr.msk.bf16.mxu0 %vm118_vm0, %v80_v8  ;;  %v82_v14 = vpack.c.bf16 %v21_v12, %v20_v11  ;;  %v24_v17 = vld [vmem:[%s2957_s0 + $0x40] sm:$0xff]  ;;  %v25_v18 = vld [vmem:[%s2957_s0 + $0x48] sm:$0xff]  ;;  %v50_v21 = vld [vmem:[%s2957_s0 + $0x110] sm:$0xff]  ;;  %v83_v28 = vpack.c.bf16 %v23_v16, %v22_v15 }
   0x6   :  { %1322 = vmatprep.subr.bf16.mxu0 %v117_v7  ;;  %1390 = vmatpush3.bf16.msra.mxu1 %v116_v3  ;;  %v48_v19 = vld [vmem:[%s2957_s0 + $0x100] sm:$0xff]  ;;  %v49_v20 = vld [vmem:[%s2957_s0 + $0x108] sm:$0xff]  ;;  %v51_v23 = vld [vmem:[%s2957_s0 + $0x118] sm:$0xff]  ;;  %v84_v29 = vpack.c.bf16 %v25_v18, %v24_v17 }
   0x7   :  { %1389 = vmatprep.subr.bf16.mxu1 %v117_v7  ;;  %v96_v22 = vpack.c.bf16 %v49_v20, %v48_v19  ;;  %v52_v24 = vld [vmem:[%s2957_s0 + $0x120] sm:$0xff]  ;;  %v53_v25 = vld [vmem:[%s2957_s0 + $0x128] sm:$0xff]  ;;  %v97_v26 = vpack.c.bf16 %v51_v23, %v50_v21  ;;  %v54_v30 = vld [vmem:[%s2957_s0 + $0x130] sm:$0xff] }
   0x8   :  { %v98_v27 = vpack.c.bf16 %v53_v25, %v52_v24  ;;  %v55_v31 = vld [vmem:[%s2957_s0 + $0x138] sm:$0xff]  ;;  %v56_v32 = vld [vmem:[%s2957_s0 + $0x140] sm:$0xff]  ;;  %v57_v33 = vld [vmem:[%s2957_s0 + $0x148] sm:$0xff] }
   0x9   :  { %1323 = vmatpush3.bf16.msra.mxu0 %v117_v7  ;;  %1356 = vmatprep.mubr.msk.bf16.mxu1 %vm118_vm0, %v96_v22  ;;  %v26_v34 = vld [vmem:[%s2957_s0 + $0x50] sm:$0xff]  ;;  %v27_v35 = vld [vmem:[%s2957_s0 + $0x58] sm:$0xff]  ;;  %v99_v36 = vpack.c.bf16 %v55_v31, %v54_v30  ;;  %v28_v37 = vld [vmem:[%s2957_s0 + $0x60] sm:$0xff]  ;;  %v100_v39 = vpack.c.bf16 %v57_v33, %v56_v32 }
   0xa   :  { %1391 = vmatpush3.bf16.msra.mxu1 %v117_v7  ;;  %v29_v38 = vld [vmem:[%s2957_s0 + $0x68] sm:$0xff] }
   0xc   :  { %1325 = vmatmul.mubr.msk.bf16.vlgmr.msra.gmra.mrb[0].mxu0 %vm118_vm0, %v81_v13 }
   0xd   :  { %1328 = vmatprep.mubr.msk.bf16.mxu0 %vm118_vm0, %v82_v14  ;;  %1357 = vmatmul.mubr.msk.bf16.vlgmr.msra.gmra.mrb[0].mxu1 %vm118_vm0, %v97_v26 }
   0xe   :  { %1360 = vmatprep.mubr.msk.bf16.mxu1 %vm118_vm0, %v98_v27 }
  0x14   :  { %1329 = vmatmul.mubr.msk.bf16.gmra.mrb[4].mxu0 %vm118_vm0, %v83_v28 }
  0x15   :  { %1332 = vmatprep.mubr.msk.bf16.mxu0 %vm118_vm0, %v84_v29 }
  0x16   :  { %8 = vsyncpa [#allocation3], 0  ;;  %v85_v40 = vpack.c.bf16 %v27_v35, %v26_v34  ;;  %v86_v41 = vpack.c.bf16 %v29_v38, %v28_v37  ;;  %1361 = vmatmul.mubr.msk.bf16.gmra.mrb[4].mxu1 %vm118_vm0, %v99_v36  ;;  %v58_v42 = vld [vmem:[%s2957_s0 + $0x150] sm:$0xff]  ;;  %v59_v43 = vld [vmem:[%s2957_s0 + $0x158] sm:$0xff] }
  0x17   :  { %1364 = vmatprep.mubr.msk.bf16.mxu1 %vm118_vm0, %v100_v39  ;;  %v60_v44 = vld [vmem:[%s2957_s0 + $0x160] sm:$0xff]  ;;  %v61_v45 = vld [vmem:[%s2957_s0 + $0x168] sm:$0xff]  ;;  %v30_v46 = vld [vmem:[%s2957_s0 + $0x70] sm:$0xff]  ;;  %v101_v48 = vpack.c.bf16 %v59_v43, %v58_v42 }
  0x18   :  { %v31_v47 = vld [vmem:[%s2957_s0 + $0x78] sm:$0xff]  ;;  %v32_v49 = vld [vmem:[%s2957_s0 + $0x80] sm:$0xff]  ;;  %v33_v50 = vld [vmem:[%s2957_s0 + $0x88] sm:$0xff]  ;;  %v102_v51 = vpack.c.bf16 %v61_v45, %v60_v44 }
  0x19   :  { %v87_v52 = vpack.c.bf16 %v31_v47, %v30_v46  ;;  %v88_v53 = vpack.c.bf16 %v33_v50, %v32_v49  ;;  %v62_v54 = vld [vmem:[%s2957_s0 + $0x170] sm:$0xff]  ;;  %v63_v55 = vld [vmem:[%s2957_s0 + $0x178] sm:$0xff]  ;;  %v64_v56 = vld [vmem:[%s2957_s0 + $0x180] sm:$0xff] }
  0x1a   :  { %v65_v57 = vld [vmem:[%s2957_s0 + $0x188] sm:$0xff]  ;;  %v34_v58 = vld [vmem:[%s2957_s0 + $0x90] sm:$0xff]  ;;  %v35_v59 = vld [vmem:[%s2957_s0 + $0x98] sm:$0xff]  ;;  %v103_v60 = vpack.c.bf16 %v63_v55, %v62_v54 }
  0x1b   :  { %v36_v61 = vld [vmem:[%s2957_s0 + $0xa0] sm:$0xff]  ;;  %v37_v62 = vld [vmem:[%s2957_s0 + $0xa8] sm:$0xff]  ;;  %v104_v63 = vpack.c.bf16 %v65_v57, %v64_v56  ;;  %v89_v0 = vpack.c.bf16 %v35_v59, %v34_v58  ;;  %v66_v2 = vld [vmem:[%s2957_s0 + $0x190] sm:$0xff] }
  0x1c   :  { %1333 = vmatmul.mubr.msk.bf16.gmra.mrb[8].mxu0 %vm118_vm0, %v85_v40  ;;  %v90_v1 = vpack.c.bf16 %v37_v62, %v36_v61  ;;  %v67_v3 = vld [vmem:[%s2957_s0 + $0x198] sm:$0xff]  ;;  %v68_v4 = vld [vmem:[%s2957_s0 + $0x1a0] sm:$0xff]  ;;  %v69_v5 = vld [vmem:[%s2957_s0 + $0x1a8] sm:$0xff] }
  0x1d   :  { %1336 = vmatprep.mubr.msk.bf16.mxu0 %vm118_vm0, %v86_v41  ;;  %v38_v6 = vld [vmem:[%s2957_s0 + $0xb0] sm:$0xff]  ;;  %v39_v7 = vld [vmem:[%s2957_s0 + $0xb8] sm:$0xff]  ;;  %v105_v8 = vpack.c.bf16 %v67_v3, %v66_v2  ;;  %v40_v9 = vld [vmem:[%s2957_s0 + $0xc0] sm:$0xff]  ;;  %v106_v11 = vpack.c.bf16 %v69_v5, %v68_v4 }
  0x1e   :  { %1365 = vmatmul.mubr.msk.bf16.gmra.mrb[8].mxu1 %vm118_vm0, %v101_v48  ;;  %v41_v10 = vld [vmem:[%s2957_s0 + $0xc8] sm:$0xff]  ;;  %v91_v12 = vpack.c.bf16 %v39_v7, %v38_v6  ;;  %v70_v14 = vld [vmem:[%s2957_s0 + $0x1b0] sm:$0xff]  ;;  %v71_v15 = vld [vmem:[%s2957_s0 + $0x1b8] sm:$0xff] }
  0x1f   :  { %1368 = vmatprep.mubr.msk.bf16.mxu1 %vm118_vm0, %v102_v51  ;;  %v92_v13 = vpack.c.bf16 %v41_v10, %v40_v9  ;;  %v72_v16 = vld [vmem:[%s2957_s0 + $0x1c0] sm:$0xff]  ;;  %v73_v17 = vld [vmem:[%s2957_s0 + $0x1c8] sm:$0xff]  ;;  %v42_v18 = vld [vmem:[%s2957_s0 + $0xd0] sm:$0xff]  ;;  %v107_v20 = vpack.c.bf16 %v71_v15, %v70_v14 }
  0x20   :  { %v43_v19 = vld [vmem:[%s2957_s0 + $0xd8] sm:$0xff]  ;;  %v44_v21 = vld [vmem:[%s2957_s0 + $0xe0] sm:$0xff]  ;;  %v45_v22 = vld [vmem:[%s2957_s0 + $0xe8] sm:$0xff]  ;;  %v108_v23 = vpack.c.bf16 %v73_v17, %v72_v16 }
  0x21   :  { %v93_v24 = vpack.c.bf16 %v43_v19, %v42_v18  ;;  %v94_v25 = vpack.c.bf16 %v45_v22, %v44_v21  ;;  %v74_v26 = vld [vmem:[%s2957_s0 + $0x1d0] sm:$0xff]  ;;  %v75_v27 = vld [vmem:[%s2957_s0 + $0x1d8] sm:$0xff]  ;;  %v76_v28 = vld [vmem:[%s2957_s0 + $0x1e0] sm:$0xff] }
  0x22   :  { %v77_v29 = vld [vmem:[%s2957_s0 + $0x1e8] sm:$0xff]  ;;  %v46_v30 = vld [vmem:[%s2957_s0 + $0xf0] sm:$0xff]  ;;  %v47_v31 = vld [vmem:[%s2957_s0 + $0xf8] sm:$0xff]  ;;  %v109_v32 = vpack.c.bf16 %v75_v27, %v74_v26 }
  0x23   :  { %v110_v33 = vpack.c.bf16 %v77_v29, %v76_v28  ;;  %v95_v34 = vpack.c.bf16 %v47_v31, %v46_v30  ;;  %v78_v35 = vld [vmem:[%s2957_s0 + $0x1f0] sm:$0xff]  ;;  %v79_v36 = vld [vmem:[%s2957_s0 + $0x1f8] sm:$0xff] }
  0x24   :  { %1337 = vmatmul.mubr.msk.bf16.gmra.mrb[12].mxu0 %vm118_vm0, %v87_v52  ;;  %v111_v37 = vpack.c.bf16 %v79_v36, %v78_v35 }
  0x25   :  { %1340 = vmatprep.mubr.msk.bf16.mxu0 %vm118_vm0, %v88_v53 }
  0x26   :  { %1369 = vmatmul.mubr.msk.bf16.gmra.mrb[12].mxu1 %vm118_vm0, %v103_v60 }
  0x27   :  { %1372 = vmatprep.mubr.msk.bf16.mxu1 %vm118_vm0, %v104_v63 }
  0x2c   :  { %1341 = vmatmul.mubr.msk.bf16.gmra.mrb[16].mxu0 %vm118_vm0, %v89_v0 }
  0x2d   :  { %1344 = vmatprep.mubr.msk.bf16.mxu0 %vm118_vm0, %v90_v1 }
  0x2e   :  { %1373 = vmatmul.mubr.msk.bf16.gmra.mrb[16].mxu1 %vm118_vm0, %v105_v8 }
  0x2f   :  { %1376 = vmatprep.mubr.msk.bf16.mxu1 %vm118_vm0, %v106_v11 }
  0x34   :  { %1345 = vmatmul.mubr.msk.bf16.gmra.mrb[20].mxu0 %vm118_vm0, %v91_v12 }
  0x35   :  { %1348 = vmatprep.mubr.msk.bf16.mxu0 %vm118_vm0, %v92_v13 }
  0x36   :  { %1377 = vmatmul.mubr.msk.bf16.gmra.mrb[20].mxu1 %vm118_vm0, %v107_v20 }
  0x37   :  { %1380 = vmatprep.mubr.msk.bf16.mxu1 %vm118_vm0, %v108_v23 }
  0x3c   :  { %1349 = vmatmul.mubr.msk.bf16.gmra.mrb[24].mxu0 %vm118_vm0, %v93_v24 }
  0x3d   :  { %1352 = vmatprep.mubr.msk.bf16.mxu0 %vm118_vm0, %v94_v25 }
  0x3e   :  { %1381 = vmatmul.mubr.msk.bf16.gmra.mrb[24].mxu1 %vm118_vm0, %v109_v32 }
  0x3f   :  { %1384 = vmatprep.mubr.msk.bf16.mxu1 %vm118_vm0, %v110_v33 }
  0x44   :  { %1353 = vmatmul.mubr.msk.bf16.gmra.mrb[28].mxu0 %vm118_vm0, %v95_v34 }
  0x46   :  { %1385 = vmatmul.mubr.msk.bf16.gmra.mrb[28].mxu1 %vm118_vm0, %v111_v37 }
  0xdf   :  { %v1808_v38 = vpop.f32.mrb[0].mxu0 }
  0xe0   :  { %v1810_v39 = vpop.f32.mrb[1].mxu0  ;;  %v1822_v45 = vpop.f32.mrb[0].mxu1  ;;  %v575_v46 = vmul.f32 %v1808_v38, %v1808_v38 }
  0xe1   :  { %v1812_v40 = vpop.f32.mrb[2].mxu0  ;;  %v573_v42 = vmul.f32 %v1810_v39, %v1810_v39  ;;  %v1827_v49 = vpop.f32.mrb[1].mxu1 }
  0xe2   :  { %v1814_v41 = vpop.f32.mrb[3].mxu0  ;;  %v1829_v50 = vpop.f32.mrb[2].mxu1  ;;  %v576_v51 = vmul.f32 %v1812_v40, %v1812_v40 }
  0xe3   :  { %v504_v43 = vadd.f32 %v1814_v41, %v1810_v39  ;;  %v574_v44 = vmul.f32 %v1814_v41, %v1814_v41  ;;  %v1836_v55 = vpop.f32.mrb[3].mxu1 }
  0xe5   :  { %v505_v47 = vadd.f32 %v1808_v38, %v504_v43  ;;  %v637_v48 = vadd.f32 %v574_v44, %v573_v42 }
  0xe7   :  { %v638_v52 = vadd.f32 %v637_v48, %v575_v46  ;;  %v1833_v53 = vpop.f32.mrb[4].mxu0  ;;  %v506_v54 = vadd.f32 %v1812_v40, %v505_v47 }
  0xe8   :  { %v1838_v56 = vpop.f32.mrb[5].mxu0  ;;  %v579_v2 = vmul.f32 %v1833_v53, %v1833_v53 }
  0xe9   :  { %v507_v57 = vadd.f32 %v506_v54, %v1838_v56  ;;  %v577_v58 = vmul.f32 %v1838_v56, %v1838_v56  ;;  %v639_v59 = vadd.f32 %v638_v52, %v576_v51  ;;  %v1843_v60 = vpop.f32.mrb[6].mxu0  ;;  %v1850_v1 = vpop.f32.mrb[4].mxu1 }
  0xea   :  { %v1845_v61 = vpop.f32.mrb[7].mxu0  ;;  %v1855_v5 = vpop.f32.mrb[5].mxu1  ;;  %v580_v7 = vmul.f32 %v1843_v60, %v1843_v60 }
  0xeb   :  { %v640_v62 = vadd.f32 %v639_v59, %v577_v58  ;;  %v508_v63 = vadd.f32 %v507_v57, %v1845_v61  ;;  %v578_v0 = vmul.f32 %v1845_v61, %v1845_v61  ;;  %v1857_v6 = vpop.f32.mrb[6].mxu1 }
  0xec   :  { %v1864_v11 = vpop.f32.mrb[7].mxu1 }
  0xed   :  { %v509_v3 = vadd.f32 %v1833_v53, %v508_v63  ;;  %v641_v4 = vadd.f32 %v640_v62, %v578_v0 }
  0xef   :  { %v642_v8 = vadd.f32 %v641_v4, %v579_v2  ;;  %v1861_v9 = vpop.f32.mrb[8].mxu0  ;;  %v510_v10 = vadd.f32 %v1843_v60, %v509_v3 }
  0xf0   :  { %v1866_v12 = vpop.f32.mrb[9].mxu0  ;;  %v583_v22 = vmul.f32 %v1861_v9, %v1861_v9 }
  0xf1   :  { %v511_v13 = vadd.f32 %v510_v10, %v1866_v12  ;;  %v581_v14 = vmul.f32 %v1866_v12, %v1866_v12  ;;  %v643_v15 = vadd.f32 %v642_v8, %v580_v7  ;;  %v1871_v16 = vpop.f32.mrb[10].mxu0  ;;  %v1878_v21 = vpop.f32.mrb[8].mxu1 }
  0xf2   :  { %v1873_v17 = vpop.f32.mrb[11].mxu0  ;;  %v1883_v25 = vpop.f32.mrb[9].mxu1  ;;  %v584_v27 = vmul.f32 %v1871_v16, %v1871_v16 }
  0xf3   :  { %v644_v18 = vadd.f32 %v643_v15, %v581_v14  ;;  %v512_v19 = vadd.f32 %v511_v13, %v1873_v17  ;;  %v582_v20 = vmul.f32 %v1873_v17, %v1873_v17  ;;  %v1885_v26 = vpop.f32.mrb[10].mxu1 }
  0xf4   :  { %v1892_v31 = vpop.f32.mrb[11].mxu1 }
  0xf5   :  { %v513_v23 = vadd.f32 %v1861_v9, %v512_v19  ;;  %v645_v24 = vadd.f32 %v644_v18, %v582_v20 }
  0xf7   :  { %v646_v28 = vadd.f32 %v645_v24, %v583_v22  ;;  %v1889_v29 = vpop.f32.mrb[12].mxu0  ;;  %v514_v30 = vadd.f32 %v1871_v16, %v513_v23 }
  0xf8   :  { %v1894_v32 = vpop.f32.mrb[13].mxu0  ;;  %v587_v47 = vmul.f32 %v1889_v29, %v1889_v29 }
  0xf9   :  { %v515_v33 = vadd.f32 %v514_v30, %v1894_v32  ;;  %v585_v34 = vmul.f32 %v1894_v32, %v1894_v32  ;;  %v647_v35 = vadd.f32 %v646_v28, %v584_v27  ;;  %v1899_v36 = vpop.f32.mrb[14].mxu0  ;;  %v1906_v46 = vpop.f32.mrb[12].mxu1 }
  0xfa   :  { %v1901_v37 = vpop.f32.mrb[15].mxu0  ;;  %v1911_v52 = vpop.f32.mrb[13].mxu1  ;;  %v588_v57 = vmul.f32 %v1899_v36, %v1899_v36 }
  0xfb   :  { %v648_v42 = vadd.f32 %v647_v35, %v585_v34  ;;  %v516_v43 = vadd.f32 %v515_v33, %v1901_v37  ;;  %v586_v44 = vmul.f32 %v1901_v37, %v1901_v37  ;;  %v1913_v54 = vpop.f32.mrb[14].mxu1 }
  0xfc   :  { %v1920_v63 = vpop.f32.mrb[15].mxu1 }
  0xfd   :  { %v517_v48 = vadd.f32 %v1889_v29, %v516_v43  ;;  %v649_v51 = vadd.f32 %v648_v42, %v586_v44 }
  0xff   :  { %v650_v58 = vadd.f32 %v649_v51, %v587_v47  ;;  %v1917_v59 = vpop.f32.mrb[16].mxu0  ;;  %v518_v62 = vadd.f32 %v1899_v36, %v517_v48 }
 0x100   :  { %3002 = vst [vmem:[#allocation5_spill] sm:$0xff] %v1917_v59  ;;  %v1922_v0 = vpop.f32.mrb[17].mxu0  ;;  %v591_v18 = vmul.f32 %v1917_v59, %v1917_v59 }
 0x101   :  { %v519_v2 = vadd.f32 %v518_v62, %v1922_v0  ;;  %v589_v3 = vmul.f32 %v1922_v0, %v1922_v0  ;;  %v651_v4 = vadd.f32 %v650_v58, %v588_v57  ;;  %v1927_v7 = vpop.f32.mrb[18].mxu0  ;;  %v1934_v15 = vpop.f32.mrb[16].mxu1 }
 0x102   :  { %3003 = vst [vmem:[#allocation6_spill] sm:$0xff] %v1927_v7  ;;  %v1929_v8 = vpop.f32.mrb[19].mxu0  ;;  %v1939_v22 = vpop.f32.mrb[17].mxu1  ;;  %v592_v24 = vmul.f32 %v1927_v7, %v1927_v7 }
 0x103   :  { %3004 = vst [vmem:[#allocation7_spill] sm:$0xff] %v1929_v8  ;;  %v652_v10 = vadd.f32 %v651_v4, %v589_v3  ;;  %v520_v13 = vadd.f32 %v519_v2, %v1929_v8  ;;  %v590_v14 = vmul.f32 %v1929_v8, %v1929_v8  ;;  %v1941_v23 = vpop.f32.mrb[18].mxu1 }
 0x104   :  { %v1948_v33 = vpop.f32.mrb[19].mxu1 }
 0x105   :  { %v521_v19 = vadd.f32 %v1917_v59, %v520_v13  ;;  %v653_v20 = vadd.f32 %v652_v10, %v590_v14 }
 0x107   :  { %v654_v27 = vadd.f32 %v653_v20, %v591_v18  ;;  %v1945_v28 = vpop.f32.mrb[20].mxu0  ;;  %v522_v30 = vadd.f32 %v1927_v7, %v521_v19 }
 0x108   :  { %3005 = vst [vmem:[#allocation8_spill] sm:$0xff] %v1945_v28  ;;  %v1950_v34 = vpop.f32.mrb[21].mxu0  ;;  %v595_v62 = vmul.f32 %v1945_v28, %v1945_v28 }
 0x109   :  { %3006 = vst [vmem:[#allocation9_spill] sm:$0xff] %v1950_v34  ;;  %v523_v35 = vadd.f32 %v522_v30, %v1950_v34  ;;  %v593_v42 = vmul.f32 %v1950_v34, %v1950_v34  ;;  %v655_v43 = vadd.f32 %v654_v27, %v592_v24  ;;  %v1955_v44 = vpop.f32.mrb[22].mxu0  ;;  %v1962_v58 = vpop.f32.mrb[20].mxu1 }
 0x10a   :  { %3007 = vst [vmem:[#allocation10_spill] sm:$0xff] %v1955_v44  ;;  %v1957_v47 = vpop.f32.mrb[23].mxu0  ;;  %3009 = vst [vmem:[#allocation12_spill] sm:$0xff] %v1962_v58  ;;  %v1967_v4 = vpop.f32.mrb[21].mxu1  ;;  %v596_v13 = vmul.f32 %v1955_v44, %v1955_v44 }
 0x10b   :  { %3008 = vst [vmem:[#allocation11_spill] sm:$0xff] %v1957_v47  ;;  %v656_v48 = vadd.f32 %v655_v43, %v593_v42  ;;  %v524_v51 = vadd.f32 %v523_v35, %v1957_v47  ;;  %v594_v57 = vmul.f32 %v1957_v47, %v1957_v47  ;;  %v1969_v10 = vpop.f32.mrb[22].mxu1 }
 0x10c   :  { %3010 = vst [vmem:[#allocation13_spill] sm:$0xff] %v1969_v10  ;;  %v1976_v20 = vpop.f32.mrb[23].mxu1 }
 0x10d   :  { %v525_v2 = vadd.f32 %v1945_v28, %v524_v51  ;;  %v657_v3 = vadd.f32 %v656_v48, %v594_v57  ;;  %3012 = vst [vmem:[#allocation15_spill] sm:$0xff] %v1976_v20 }
 0x10f   :  { %v658_v14 = vadd.f32 %v657_v3, %v595_v62  ;;  %v1973_v18 = vpop.f32.mrb[24].mxu0  ;;  %v526_v19 = vadd.f32 %v1955_v44, %v525_v2 }
 0x110   :  { %3011 = vst [vmem:[#allocation14_spill] sm:$0xff] %v1973_v18  ;;  %v1978_v24 = vpop.f32.mrb[25].mxu0  ;;  %v599_v2 = vmul.f32 %v1973_v18, %v1973_v18 }
 0x111   :  { %3013 = vst [vmem:[#allocation16_spill] sm:$0xff] %v1978_v24  ;;  %v527_v27 = vadd.f32 %v526_v19, %v1978_v24  ;;  %v597_v30 = vmul.f32 %v1978_v24, %v1978_v24  ;;  %v659_v35 = vadd.f32 %v658_v14, %v596_v13  ;;  %v1983_v42 = vpop.f32.mrb[26].mxu0  ;;  %v1990_v62 = vpop.f32.mrb[24].mxu1 }
 0x112   :  { %3014 = vst [vmem:[#allocation17_spill] sm:$0xff] %v1983_v42  ;;  %v1985_v43 = vpop.f32.mrb[27].mxu0  ;;  %3016 = vst [vmem:[#allocation19_spill] sm:$0xff] %v1990_v62  ;;  %v1995_v24 = vpop.f32.mrb[25].mxu1  ;;  %v600_v14 = vmul.f32 %v1983_v42, %v1983_v42 }
 0x113   :  { %3015 = vst [vmem:[#allocation18_spill] sm:$0xff] %v1985_v43  ;;  %v660_v48 = vadd.f32 %v659_v35, %v597_v30  ;;  %v528_v51 = vadd.f32 %v527_v27, %v1985_v43  ;;  %v598_v57 = vmul.f32 %v1985_v43, %v1985_v43  ;;  %3017 = vst [vmem:[#allocation20_spill] sm:$0xff] %v1995_v24  ;;  %v1997_v13 = vpop.f32.mrb[26].mxu1 }
 0x114   :  { %3018 = vst [vmem:[#allocation21_spill] sm:$0xff] %v1997_v13  ;;  %v2004_v43 = vpop.f32.mrb[27].mxu1 }
 0x115   :  { %v529_v3 = vadd.f32 %v1973_v18, %v528_v51  ;;  %v661_v19 = vadd.f32 %v660_v48, %v598_v57  ;;  %3020 = vst [vmem:[#allocation23_spill] sm:$0xff] %v2004_v43 }
 0x117   :  { %v662_v30 = vadd.f32 %v661_v19, %v599_v2  ;;  %v2001_v27 = vpop.f32.mrb[28].mxu0  ;;  %v530_v35 = vadd.f32 %v1983_v42, %v529_v3 }
 0x118   :  { %3019 = vst [vmem:[#allocation22_spill] sm:$0xff] %v2001_v27  ;;  %v2006_v44 = vpop.f32.mrb[29].mxu0  ;;  %v603_v42 = vmul.f32 %v2001_v27, %v2001_v27 }
 0x119   :  { %3021 = vst [vmem:[#allocation24_spill] sm:$0xff] %v2006_v44  ;;  %v531_v28 = vadd.f32 %v530_v35, %v2006_v44  ;;  %v601_v48 = vmul.f32 %v2006_v44, %v2006_v44  ;;  %v663_v51 = vadd.f32 %v662_v30, %v600_v14  ;;  %v2011_v57 = vpop.f32.mrb[30].mxu0  ;;  %v2018_v19 = vpop.f32.mrb[28].mxu1 }
 0x11a   :  { %3022 = vst [vmem:[#allocation25_spill] sm:$0xff] %v2011_v57  ;;  %v2013_v18 = vpop.f32.mrb[31].mxu0  ;;  %3024 = vst [vmem:[#allocation27_spill] sm:$0xff] %v2018_v19  ;;  %v2023_v44 = vpop.f32.mrb[29].mxu1  ;;  %v604_v30 = vmul.f32 %v2011_v57, %v2011_v57 }
 0x11b   :  { %3023 = vst [vmem:[#allocation26_spill] sm:$0xff] %v2013_v18  ;;  %v664_v47 = vadd.f32 %v663_v51, %v601_v48  ;;  %v532_v2 = vadd.f32 %v531_v28, %v2013_v18  ;;  %v602_v3 = vmul.f32 %v2013_v18, %v2013_v18  ;;  %3025 = vst [vmem:[#allocation28_spill] sm:$0xff] %v2023_v44  ;;  %v2025_v14 = vpop.f32.mrb[30].mxu1 }
 0x11c   :  { %v605_v51 = vmul.f32 %v1827_v49, %v1827_v49  ;;  %v2032_v18 = vpop.f32.mrb[31].mxu1 }
 0x11d   :  { %v533_v35 = vadd.f32 %v2001_v27, %v532_v2  ;;  %v665_v34 = vadd.f32 %v664_v47, %v602_v3  ;;  %v606_v3 = vmul.f32 %v1836_v55, %v1836_v55  ;;  %v607_v27 = vmul.f32 %v1822_v45, %v1822_v45 }
 0x11f   :  { %v666_v48 = vadd.f32 %v665_v34, %v603_v42  ;;  %v534_v28 = vadd.f32 %v2011_v57, %v533_v35  ;;  %v608_v35 = vmul.f32 %v1829_v50, %v1829_v50 }
 0x121   :  { %v535_v7 = vadd.f32 %v534_v28, %v1827_v49  ;;  %v667_v59 = vadd.f32 %v666_v48, %v604_v30 }
 0x123   :  { %v668_v2 = vadd.f32 %v667_v59, %v605_v51  ;;  %v536_v47 = vadd.f32 %v535_v7, %v1836_v55  ;;  %v609_v59 = vmul.f32 %v1855_v5, %v1855_v5  ;;  %v610_v51 = vmul.f32 %v1864_v11, %v1864_v11 }
 0x125   :  { %v537_v34 = vadd.f32 %v1822_v45, %v536_v47  ;;  %v669_v42 = vadd.f32 %v668_v2, %v606_v3  ;;  %v611_v2 = vmul.f32 %v1850_v1, %v1850_v1  ;;  %v612_v3 = vmul.f32 %v1857_v6, %v1857_v6 }
 0x127   :  { %v670_v57 = vadd.f32 %v669_v42, %v607_v27  ;;  %v538_v8 = vadd.f32 %v1829_v50, %v537_v34 }
 0x129   :  { %v539_v7 = vadd.f32 %v538_v8, %v1855_v5  ;;  %v671_v30 = vadd.f32 %v670_v57, %v608_v35  ;;  %v613_v8 = vmul.f32 %v1883_v25, %v1883_v25 }
 0x12b   :  { %v672_v48 = vadd.f32 %v671_v30, %v609_v59  ;;  %v540_v28 = vadd.f32 %v539_v7, %v1864_v11  ;;  %v614_v30 = vmul.f32 %v1892_v31, %v1892_v31 }
 0x12d   :  { %v541_v47 = vadd.f32 %v1850_v1, %v540_v28  ;;  %v673_v27 = vadd.f32 %v672_v48, %v610_v51  ;;  %v615_v48 = vmul.f32 %v1878_v21, %v1878_v21 }
 0x12f   :  { %v674_v34 = vadd.f32 %v673_v27, %v611_v2  ;;  %v542_v42 = vadd.f32 %v1857_v6, %v541_v47  ;;  %v616_v2 = vmul.f32 %v1885_v26, %v1885_v26 }
 0x131   :  { %v543_v57 = vadd.f32 %v542_v42, %v1883_v25  ;;  %v675_v35 = vadd.f32 %v674_v34, %v612_v3  ;;  %v617_v3 = vmul.f32 %v1911_v52, %v1911_v52 }
 0x133   :  { %v676_v59 = vadd.f32 %v675_v35, %v613_v8  ;;  %v544_v7 = vadd.f32 %v543_v57, %v1892_v31  ;;  %v618_v35 = vmul.f32 %v1920_v63, %v1920_v63 }
 0x135   :  { %v545_v28 = vadd.f32 %v1878_v21, %v544_v7  ;;  %v677_v51 = vadd.f32 %v676_v59, %v614_v30  ;;  %v619_v59 = vmul.f32 %v1906_v46, %v1906_v46 }
 0x137   :  { %v678_v47 = vadd.f32 %v677_v51, %v615_v48  ;;  %v546_v27 = vadd.f32 %v1885_v26, %v545_v28  ;;  %v620_v48 = vmul.f32 %v1913_v54, %v1913_v54 }
 0x139   :  { %v547_v34 = vadd.f32 %v546_v27, %v1911_v52  ;;  %v679_v42 = vadd.f32 %v678_v47, %v616_v2  ;;  %v621_v2 = vmul.f32 %v1939_v22, %v1939_v22 }
 0x13b   :  { %v680_v8 = vadd.f32 %v679_v42, %v617_v3  ;;  %v548_v57 = vadd.f32 %v547_v34, %v1920_v63  ;;  %v622_v42 = vmul.f32 %v1948_v33, %v1948_v33 }
 0x13d   :  { %v549_v7 = vadd.f32 %v1906_v46, %v548_v57  ;;  %v681_v30 = vadd.f32 %v680_v8, %v618_v35  ;;  %v623_v8 = vmul.f32 %v1934_v15, %v1934_v15 }
 0x13f   :  { %v682_v28 = vadd.f32 %v681_v30, %v619_v59  ;;  %v550_v51 = vadd.f32 %v1913_v54, %v549_v7  ;;  %v624_v59 = vmul.f32 %v1941_v23, %v1941_v23 }
 0x141   :  { %v551_v47 = vadd.f32 %v550_v51, %v1939_v22  ;;  %v683_v27 = vadd.f32 %v682_v28, %v620_v48  ;;  %v625_v48 = vmul.f32 %v1967_v4, %v1967_v4 }
 0x143   :  { %v684_v3 = vadd.f32 %v683_v27, %v621_v2  ;;  %v552_v34 = vadd.f32 %v551_v47, %v1948_v33  ;;  %v626_v27 = vmul.f32 %v1976_v20, %v1976_v20 }
 0x145   :  { %v553_v57 = vadd.f32 %v1934_v15, %v552_v34  ;;  %v685_v35 = vadd.f32 %v684_v3, %v622_v42  ;;  %v627_v3 = vmul.f32 %v1962_v58, %v1962_v58 }
 0x147   :  { %v686_v7 = vadd.f32 %v685_v35, %v623_v8  ;;  %v554_v30 = vadd.f32 %v1941_v23, %v553_v57  ;;  %v628_v8 = vmul.f32 %v1969_v10, %v1969_v10 }
 0x149   :  { %v555_v28 = vadd.f32 %v554_v30, %v1967_v4  ;;  %v687_v51 = vadd.f32 %v686_v7, %v624_v59  ;;  %v629_v59 = vmul.f32 %v1995_v24, %v1995_v24 }
 0x14b   :  { %v688_v2 = vadd.f32 %v687_v51, %v625_v48  ;;  %v556_v47 = vadd.f32 %v555_v28, %v1976_v20  ;;  %v630_v51 = vmul.f32 %v2004_v43, %v2004_v43 }
 0x14d   :  { %v557_v34 = vadd.f32 %v1962_v58, %v556_v47  ;;  %v689_v42 = vadd.f32 %v688_v2, %v626_v27  ;;  %v631_v2 = vmul.f32 %v1990_v62, %v1990_v62 }
 0x14f   :  { %v690_v57 = vadd.f32 %v689_v42, %v627_v3  ;;  %v558_v35 = vadd.f32 %v1969_v10, %v557_v34  ;;  %v632_v3 = vmul.f32 %v1997_v13, %v1997_v13 }
 0x151   :  { %v559_v7 = vadd.f32 %v558_v35, %v1995_v24  ;;  %v691_v30 = vadd.f32 %v690_v57, %v628_v8  ;;  %v633_v8 = vmul.f32 %v2023_v44, %v2023_v44 }
 0x153   :  { %v692_v48 = vadd.f32 %v691_v30, %v629_v59  ;;  %v560_v28 = vadd.f32 %v559_v7, %v2004_v43  ;;  %v634_v30 = vmul.f32 %v2032_v18, %v2032_v18 }
 0x155   :  { %v561_v47 = vadd.f32 %v1990_v62, %v560_v28  ;;  %v693_v27 = vadd.f32 %v692_v48, %v630_v51  ;;  %v635_v48 = vmul.f32 %v2018_v19, %v2018_v19 }
 0x157   :  { %v694_v34 = vadd.f32 %v693_v27, %v631_v2  ;;  %v562_v42 = vadd.f32 %v1997_v13, %v561_v47  ;;  %v636_v2 = vmul.f32 %v2025_v14, %v2025_v14 }
 0x159   :  { %v563_v57 = vadd.f32 %v562_v42, %v2023_v44  ;;  %v695_v35 = vadd.f32 %v694_v34, %v632_v3 }
 0x15b   :  { %v696_v59 = vadd.f32 %v695_v35, %v633_v8  ;;  %v564_v7 = vadd.f32 %v563_v57, %v2032_v18 }
 0x15d   :  { %v565_v28 = vadd.f32 %v2018_v19, %v564_v7  ;;  %v697_v51 = vadd.f32 %v696_v59, %v634_v30 }
 0x15f   :  { %v566_v47 = vadd.f32 %v2025_v14, %v565_v28  ;;  %v698_v27 = vadd.f32 %v697_v51, %v635_v48  ;;  %v718_v48 = vlaneseq }
 0x161   :  { %v567_v42 = vrot.slane %v566_v47, 4  ;;  %v699_v3 = vadd.f32 %v698_v27, %v636_v2  ;;  %v719_v51 = vshrl.u32 %v718_v48, 7  ;;  %v711_v2 = vld [vmem:[%s2959_s2] sm:$0x1]  ;;  %v3031_v48 = vld [vmem:[#allocation8_spill] sm:$0xff] }
 0x163   :  { %v568_v34 = vadd.f32 %v567_v42, %v566_v47  ;;  %v700_v8 = vrot.slane %v699_v3, 4  ;;  %v720_v47 = vsub.s32 0, %v719_v51 }
 0x165   :  { %v569_v57 = vrot.slane %v568_v34, 2  ;;  %v701_v35 = vadd.f32 %v700_v8, %v699_v3 }
 0x167   :  { %v570_v44 = vadd.f32 %v569_v57, %v568_v34  ;;  %v702_v13 = vrot.slane %v701_v35, 2  ;;  %v3027_v57 = vld [vmem:[#allocation5_spill] sm:$0xff] }
 0x169   :  { %v571_v62 = vrot.slane %v570_v44, 1  ;;  %v703_v43 = vadd.f32 %v702_v13, %v701_v35  ;;  %v3028_v35 = vld [vmem:[#allocation6_spill] sm:$0xff] }
 0x16b   :  { %v572_v24 = vadd.f32 %v571_v62, %v570_v44  ;;  %v704_v10 = vrot.slane %v703_v43, 1  ;;  %v715_v44 = vld [vmem:[%s2959_s2 + $0x1] sm:$0x1]  ;;  %s1549_s2 = smov [#allocation2]  }
 0x16c   :  { %s1243_s11 = sshll.u32 %s1549_s2, 4  ;;  %s1244_s11 = int_to_ptr.vmem [resolvable:$true] %s1243_s11 }
 0x16d   :  { %v705_v7 = vadd.f32 %v704_v10, %v703_v43  ;;  %v706_v59 = vmul.f32 0.001953125, %v572_v24  ;;  %s1525_s12 = scalar_lea.vmem %s1244_s11, 8192  ;;  %p1530_p1 = scmp.lt.s32.totalorder %s1244_s11, %s1244_s11 }
 0x16e   :  { %p1526_p0 = scmp.ne.s32.totalorder %s1244_s11, %s1525_s12  ;;  %p1531_p2 = scmp.lt.s32.totalorder %s1525_s12, %s1525_s12 }
 0x16f   :  { %v707_v30 = vmul.f32 0.001953125, %v705_v7  ;;  %v708_v19 = vmul.f32 %v706_v59, %v706_v59 }
 0x170   :  { %p1532_p3 = por %p1531_p2, %p1530_p1 }
 0x171   :  { %v709_v58 = vsub.f32 %v707_v30, %v708_v19 }
 0x172   :  { %p1533_p4 = pnand %p1532_p3, %p1526_p0 }
 0x173   :  { %v710_v20 = vmax.f32 %v709_v58, 0.0 }
 0x175   :  { %v712_v28 = vadd.f32 1e-05, %v710_v20 }
 0x177   :  { %1395 = vrsqrt.f32 %v712_v28 }
 0x181   :  { %v1396_v27 = vpop.eup %1395 }
 0x182   :  { %v714_v42 = vmul.f32 %v1396_v27, %v711_v2  ;;  %v3032_v2 = vld [vmem:[#allocation10_spill] sm:$0xff]  ;;  %v3033_v27 = vld [vmem:[#allocation16_spill] sm:$0xff] }
 0x184   :  { %v716_v10 = vmul.f32 %v714_v42, %v706_v59  ;;  %v2134_v24 = vrot.slane %v714_v42, %v720_v47 }
 0x186   :  { %v717_v43 = vsub.f32 %v715_v44, %v716_v10  ;;  %v783_v58 = vmul.f32 %v2134_v24, %v2032_v18  ;;  %v2140_v20 = vmul.f32 %v2134_v24, %v1810_v39  ;;  %v2144_v62 = vmul.f32 %v2134_v24, %v1814_v41  ;;  %v3034_v44 = vld [vmem:[#allocation18_spill] sm:$0xff] }
 0x187   :  { %v2148_v13 = vmul.f32 %v1808_v38, %v2134_v24  ;;  %v2152_v19 = vmul.f32 %v1812_v40, %v2134_v24  ;;  %v2156_v3 = vmul.f32 %v2134_v24, %v1838_v56  ;;  %v2160_v39 = vmul.f32 %v2134_v24, %v1845_v61 }
 0x188   :  { %v2162_v18 = vrot.slane %v717_v43, %v720_v47  ;;  %v2166_v41 = vmul.f32 %v1833_v53, %v2134_v24  ;;  %v2170_v38 = vmul.f32 %v1843_v60, %v2134_v24  ;;  %v2174_v40 = vmul.f32 %v2134_v24, %v1866_v12  ;;  %v3035_v43 = vld [vmem:[#allocation14_spill] sm:$0xff] }
 0x189   :  { %v2178_v56 = vmul.f32 %v2134_v24, %v1873_v17  ;;  %v2182_v61 = vmul.f32 %v1861_v9, %v2134_v24  ;;  %v2186_v53 = vmul.f32 %v1871_v16, %v2134_v24  ;;  %v2190_v60 = vmul.f32 %v2134_v24, %v1894_v32  ;;  %v3026_v32 = vld [vmem:[#allocation7_spill] sm:$0xff] }
 0x18a   :  { %v851_v34 = vadd.f32 %v2162_v18, %v783_v58  ;;  %v2195_v12 = vmul.f32 %v2134_v24, %v1901_v37  ;;  %v2199_v17 = vmul.f32 %v1889_v29, %v2134_v24  ;;  %v2203_v9 = vmul.f32 %v1899_v36, %v2134_v24  ;;  %v3029_v36 = vld [vmem:[#allocation9_spill] sm:$0xff] }
 0x18b   :  { %v2207_v16 = vmul.f32 %v2134_v24, %v1922_v0  ;;  %v2211_v8 = vmul.f32 %v2134_v24, %v3026_v32  ;;  %v2215_v37 = vmul.f32 %v3027_v57, %v2134_v24  ;;  %v2219_v29 = vmul.f32 %v3028_v35, %v2134_v24  ;;  %v3030_v0 = vld [vmem:[#allocation11_spill] sm:$0xff]  ;;  %v3037_v57 = vld [vmem:[#allocation24_spill] sm:$0xff] }
 0x18c   :  { %v915_v7 = vmul.f32 0.5, %v851_v34  ;;  %v979_v59 = vmul.f32 0.70710677, %v851_v34  ;;  %v2223_v30 = vmul.f32 %v2134_v24, %v3029_v36  ;;  %v2227_v28 = vmul.f32 %v2134_v24, %v3030_v0  ;;  %v3036_v34 = vld [vmem:[#allocation17_spill] sm:$0xff]  ;;  %v3038_v36 = vld [vmem:[#allocation26_spill] sm:$0xff] }
 0x18d   :  { %v2231_v51 = vmul.f32 %v3031_v48, %v2134_v24  ;;  %v2235_v47 = vmul.f32 %v3032_v2, %v2134_v24  ;;  %v2239_v42 = vmul.f32 %v2134_v24, %v3033_v27  ;;  %v2243_v10 = vmul.f32 %v2134_v24, %v3034_v44  ;;  %v3039_v48 = vld [vmem:[#allocation22_spill] sm:$0xff] }
 0x18e   :  { %1397 = verf.f32 %v979_v59  ;;  %v2247_v58 = vmul.f32 %v3035_v43, %v2134_v24  ;;  %v2251_v32 = vmul.f32 %v3036_v34, %v2134_v24  ;;  %v2255_v35 = vmul.f32 %v2134_v24, %v3037_v57  ;;  %v3040_v59 = vld [vmem:[#allocation25_spill] sm:$0xff] }
 0x18f   :  { %v2259_v0 = vmul.f32 %v2134_v24, %v3038_v36  ;;  %v2263_v2 = vmul.f32 %v3039_v48, %v2134_v24  ;;  %v2267_v27 = vmul.f32 %v3040_v59, %v2134_v24  ;;  %v2271_v44 = vmul.f32 %v2134_v24, %v1827_v49  ;;  %v3045_v48 = vld [vmem:[#allocation15_spill] sm:$0xff]  ;;  %v3047_v59 = vld [vmem:[#allocation12_spill] sm:$0xff] }
 0x190   :  { %v2275_v43 = vmul.f32 %v2134_v24, %v1836_v55  ;;  %v2279_v34 = vmul.f32 %v1822_v45, %v2134_v24  ;;  %v2283_v57 = vmul.f32 %v1829_v50, %v2134_v24  ;;  %v2287_v36 = vmul.f32 %v2134_v24, %v1855_v5 }
 0x191   :  { %v2291_v49 = vmul.f32 %v2134_v24, %v1864_v11  ;;  %v2295_v55 = vmul.f32 %v1850_v1, %v2134_v24  ;;  %v2299_v45 = vmul.f32 %v1857_v6, %v2134_v24  ;;  %v2303_v50 = vmul.f32 %v2134_v24, %v1883_v25 }
 0x192   :  { %v2307_v5 = vmul.f32 %v2134_v24, %v1892_v31  ;;  %v2311_v11 = vmul.f32 %v1878_v21, %v2134_v24  ;;  %v2315_v1 = vmul.f32 %v1885_v26, %v2134_v24  ;;  %v2319_v6 = vmul.f32 %v2134_v24, %v1911_v52 }
 0x193   :  { %v2323_v25 = vmul.f32 %v2134_v24, %v1920_v63  ;;  %v2327_v31 = vmul.f32 %v1906_v46, %v2134_v24  ;;  %v2331_v21 = vmul.f32 %v1913_v54, %v2134_v24  ;;  %v2335_v26 = vmul.f32 %v2134_v24, %v1939_v22 }
 0x194   :  { %v2339_v52 = vmul.f32 %v2134_v24, %v1948_v33  ;;  %v2343_v63 = vmul.f32 %v1934_v15, %v2134_v24  ;;  %v2347_v46 = vmul.f32 %v1941_v23, %v2134_v24  ;;  %v2351_v54 = vmul.f32 %v2134_v24, %v1967_v4 }
 0x195   :  { %v2355_v22 = vmul.f32 %v2134_v24, %v3045_v48  ;;  %v2359_v33 = vmul.f32 %v3047_v59, %v2134_v24 }
 0x196   :  { %3041 = vst [vmem:[#allocation7_spill] sm:$0xff] %v2339_v52  ;;  %3042 = vst [vmem:[#allocation5_spill] sm:$0xff] %v2343_v63  ;;  %v3049_v52 = vld [vmem:[#allocation13_spill] sm:$0xff]  ;;  %v3051_v63 = vld [vmem:[#allocation20_spill] sm:$0xff] }
 0x197   :  { %3043 = vst [vmem:[#allocation6_spill] sm:$0xff] %v2347_v46  ;;  %3044 = vst [vmem:[#allocation9_spill] sm:$0xff] %v2351_v54  ;;  %v2363_v15 = vmul.f32 %v3049_v52, %v2134_v24  ;;  %v2367_v23 = vmul.f32 %v2134_v24, %v3051_v63  ;;  %v3052_v46 = vld [vmem:[#allocation23_spill] sm:$0xff] }
 0x198   :  { %3046 = vst [vmem:[#allocation11_spill] sm:$0xff] %v2355_v22  ;;  %3048 = vst [vmem:[#allocation8_spill] sm:$0xff] %v2359_v33  ;;  %v2371_v4 = vmul.f32 %v2134_v24, %v3052_v46  ;;  %v3053_v54 = vld [vmem:[#allocation19_spill] sm:$0xff]  ;;  %v3054_v22 = vld [vmem:[#allocation21_spill] sm:$0xff]  ;;  %v2391_v46 = vmul.f32 %v2025_v14, %v2134_v24  ;;  %v2411_v14 = vadd.f32 %v2162_v18, %v2156_v3 }
 0x199   :  { %3050 = vst [vmem:[#allocation10_spill] sm:$0xff] %v2363_v15  ;;  %v2375_v48 = vmul.f32 %v3053_v54, %v2134_v24  ;;  %v2379_v59 = vmul.f32 %v3054_v22, %v2134_v24  ;;  %v3056_v33 = vld [vmem:[#allocation28_spill] sm:$0xff]  ;;  %v3057_v15 = vld [vmem:[#allocation27_spill] sm:$0xff]  ;;  %v2395_v54 = vadd.f32 %v2162_v18, %v2140_v20  ;;  %v2399_v22 = vadd.f32 %v2162_v18, %v2144_v62 }
 0x19a   :  { %v2383_v52 = vmul.f32 %v2134_v24, %v3056_v33  ;;  %v2387_v63 = vmul.f32 %v3057_v15, %v2134_v24  ;;  %v2403_v33 = vadd.f32 %v2162_v18, %v2148_v13  ;;  %v2407_v15 = vadd.f32 %v2162_v18, %v2152_v19 }
 0x19b   :  { %3055 = vst [vmem:[#allocation16_spill] sm:$0xff] %v2379_v59  ;;  %v1398_v59 = vpop.eup %1397  ;;  %v2415_v24 = vadd.f32 %v2162_v18, %v2160_v39  ;;  %v2419_v62 = vadd.f32 %v2162_v18, %v2166_v41  ;;  %v2423_v13 = vadd.f32 %v2162_v18, %v2170_v38  ;;  %v2427_v19 = vadd.f32 %v2162_v18, %v2174_v40 }
 0x19c   :  { %v1107_v20 = vadd.f32 1.0, %v1398_v59  ;;  %v2431_v3 = vadd.f32 %v2162_v18, %v2178_v56  ;;  %v2435_v39 = vadd.f32 %v2162_v18, %v2182_v61  ;;  %v2439_v41 = vadd.f32 %v2162_v18, %v2186_v53 }
 0x19d   :  { %v2443_v38 = vadd.f32 %v2162_v18, %v2190_v60  ;;  %v2447_v40 = vadd.f32 %v2162_v18, %v2195_v12  ;;  %v2451_v56 = vadd.f32 %v2162_v18, %v2199_v17  ;;  %v2455_v61 = vadd.f32 %v2162_v18, %v2203_v9 }
 0x19e   :  { %v1171_v59 = vmul.f32 %v1107_v20, %v915_v7  ;;  %v2459_v53 = vadd.f32 %v2162_v18, %v2207_v16  ;;  %v2463_v60 = vadd.f32 %v2162_v18, %v2211_v8  ;;  %v2467_v12 = vadd.f32 %v2162_v18, %v2215_v37  ;;  %v3063_v20 = vld [vmem:[#allocation5_spill] sm:$0xff] }
 0x19f   :  { %v2471_v17 = vadd.f32 %v2162_v18, %v2219_v29  ;;  %v2475_v9 = vadd.f32 %v2162_v18, %v2223_v30  ;;  %v2479_v16 = vadd.f32 %v2162_v18, %v2227_v28  ;;  %v2483_v8 = vadd.f32 %v2162_v18, %v2231_v51 }
 0x1a0   :  { %1235 = vst [vmem:[#allocation2 + $0x1e8] sm:$0xff] %v1171_v59  ;;  %v2487_v37 = vadd.f32 %v2162_v18, %v2235_v47  ;;  %v2491_v29 = vadd.f32 %v2162_v18, %v2239_v42  ;;  %v2495_v7 = vadd.f32 %v2162_v18, %v2243_v10  ;;  %v2499_v30 = vadd.f32 %v2162_v18, %v2247_v58  ;;  %v3065_v59 = vld [vmem:[#allocation6_spill] sm:$0xff] }
 0x1a1   :  { %v2503_v28 = vadd.f32 %v2162_v18, %v2251_v32  ;;  %v2507_v51 = vadd.f32 %v2162_v18, %v2255_v35  ;;  %v2511_v47 = vadd.f32 %v2162_v18, %v2259_v0  ;;  %v2515_v42 = vadd.f32 %v2162_v18, %v2263_v2 }
 0x1a2   :  { %v2519_v10 = vadd.f32 %v2162_v18, %v2267_v27  ;;  %v2523_v58 = vadd.f32 %v2162_v18, %v2271_v44  ;;  %v2527_v32 = vadd.f32 %v2162_v18, %v2275_v43  ;;  %v2531_v35 = vadd.f32 %v2162_v18, %v2279_v34 }
 0x1a3   :  { %v2535_v0 = vadd.f32 %v2162_v18, %v2283_v57  ;;  %v2539_v2 = vadd.f32 %v2162_v18, %v2287_v36  ;;  %v2543_v27 = vadd.f32 %v2162_v18, %v2291_v49  ;;  %v2547_v44 = vadd.f32 %v2162_v18, %v2295_v55 }
 0x1a4   :  { %v2551_v43 = vadd.f32 %v2162_v18, %v2299_v45  ;;  %v2555_v34 = vadd.f32 %v2162_v18, %v2303_v50  ;;  %v2559_v57 = vadd.f32 %v2162_v18, %v2307_v5  ;;  %v2563_v36 = vadd.f32 %v2162_v18, %v2311_v11 }
 0x1a5   :  { %v2567_v49 = vadd.f32 %v2162_v18, %v2315_v1  ;;  %v2571_v55 = vadd.f32 %v2162_v18, %v2319_v6  ;;  %v2575_v45 = vadd.f32 %v2162_v18, %v2323_v25  ;;  %v2579_v50 = vadd.f32 %v2162_v18, %v2327_v31  ;;  %v3061_v1 = vld [vmem:[#allocation7_spill] sm:$0xff] }
 0x1a6   :  { %v2583_v5 = vadd.f32 %v2162_v18, %v2331_v21  ;;  %v2587_v11 = vadd.f32 %v2162_v18, %v2335_v26  ;;  %v2591_v6 = vadd.f32 %v2162_v18, %v3061_v1  ;;  %v2595_v25 = vadd.f32 %v2162_v18, %v3063_v20 }
 0x1a7   :  { %3058 = vst [vmem:[#allocation18_spill] sm:$0xff] %v2579_v50  ;;  %v2599_v31 = vadd.f32 %v2162_v18, %v3065_v59  ;;  %v3067_v50 = vld [vmem:[#allocation9_spill] sm:$0xff]  ;;  %v2619_v59 = vadd.f32 %v2162_v18, %v2367_v23  ;;  %v2639_v23 = vadd.f32 %v2162_v18, %v2387_v63  ;;  %v2661_v63 = vmul.f32 0.5, %v2415_v24 }
 0x1a8   :  { %3059 = vst [vmem:[#allocation14_spill] sm:$0xff] %v2583_v5  ;;  %3060 = vst [vmem:[#allocation17_spill] sm:$0xff] %v2587_v11  ;;  %v2603_v21 = vadd.f32 %v2162_v18, %v3067_v50  ;;  %v3069_v5 = vld [vmem:[#allocation11_spill] sm:$0xff]  ;;  %v3071_v11 = vld [vmem:[#allocation8_spill] sm:$0xff]  ;;  %v2623_v50 = vadd.f32 %v2162_v18, %v2371_v4  ;;  %v2643_v4 = vadd.f32 %v2162_v18, %v2391_v46  ;;  %v2667_v46 = vmul.f32 0.5, %v2423_v13 }
 0x1a9   :  { %3062 = vst [vmem:[#allocation24_spill] sm:$0xff] %v2591_v6  ;;  %3064 = vst [vmem:[#allocation26_spill] sm:$0xff] %v2595_v25  ;;  %v2607_v26 = vadd.f32 %v2162_v18, %v3069_v5  ;;  %v2611_v1 = vadd.f32 %v2162_v18, %v3071_v11  ;;  %v3073_v6 = vld [vmem:[#allocation10_spill] sm:$0xff]  ;;  %v2627_v5 = vadd.f32 %v2162_v18, %v2375_v48  ;;  %v2649_v48 = vmul.f32 0.5, %v2399_v22 }
 0x1aa   :  { %3066 = vst [vmem:[#allocation22_spill] sm:$0xff] %v2599_v31  ;;  %3068 = vst [vmem:[#allocation25_spill] sm:$0xff] %v2603_v21  ;;  %v2615_v20 = vadd.f32 %v2162_v18, %v3073_v6  ;;  %v2635_v6 = vadd.f32 %v2162_v18, %v2383_v52  ;;  %v2655_v52 = vmul.f32 0.5, %v2407_v15  ;;  %v2691_v21 = vmul.f32 0.5, %v2455_v61 }
 0x1ab   :  { %3070 = vst [vmem:[#allocation15_spill] sm:$0xff] %v2607_v26  ;;  %3072 = vst [vmem:[#allocation12_spill] sm:$0xff] %v2611_v1  ;;  %v3078_v26 = vld [vmem:[#allocation16_spill] sm:$0xff]  ;;  %v2688_v1 = vmul.f32 0.5, %v2451_v56  ;;  %v2694_v31 = vmul.f32 0.5, %v2459_v53  ;;  %v2697_v25 = vmul.f32 0.5, %v2463_v60 }
 0x1ac   :  { %3074 = vst [vmem:[#allocation13_spill] sm:$0xff] %v2615_v20  ;;  %3075 = vst [vmem:[#allocation20_spill] sm:$0xff] %v2619_v59  ;;  %v2631_v11 = vadd.f32 %v2162_v18, %v3078_v26  ;;  %v2652_v26 = vmul.f32 0.5, %v2403_v33  ;;  %v2664_v18 = vmul.f32 0.5, %v2419_v62  ;;  %v2682_v59 = vmul.f32 0.5, %v2443_v38 }
 0x1ad   :  { %3076 = vst [vmem:[#allocation23_spill] sm:$0xff] %v2623_v50  ;;  %3077 = vst [vmem:[#allocation19_spill] sm:$0xff] %v2627_v5  ;;  %v2646_v50 = vmul.f32 0.5, %v2395_v54  ;;  %v2679_v5 = vmul.f32 0.5, %v2439_v41  ;;  %v2685_v20 = vmul.f32 0.5, %v2447_v40 }
 0x1ae   :  { %3079 = vst [vmem:[#allocation21_spill] sm:$0xff] %v2631_v11  ;;  %3080 = vst [vmem:[#allocation28_spill] sm:$0xff] %v2635_v6  ;;  %v2658_v6 = vmul.f32 0.5, %v2411_v14  ;;  %v2676_v11 = vmul.f32 0.5, %v2435_v39 }
 0x1af   :  { %3081 = vst [vmem:[#allocation27_spill] sm:$0xff] %v2639_v23  ;;  %3082 = vst [vmem:[#allocation7_spill] sm:$0xff] %v2643_v4  ;;  %v2670_v4 = vmul.f32 0.5, %v2427_v19  ;;  %v2673_v23 = vmul.f32 0.5, %v2431_v3 }
 0x1b0   :  { %3084 = vst [vmem:[#allocation6_spill] sm:$0xff] %v2676_v11  ;;  %3085 = vst [vmem:[#allocation9_spill] sm:$0xff] %v2679_v5  ;;  %v2700_v5 = vmul.f32 0.5, %v2467_v12  ;;  %v919_v11 = vmul.f32 0.70710677, %v2399_v22  ;;  %v2729_v22 = vmul.f32 0.5, %v2499_v30 }
 0x1b1   :  { %3083 = vst [vmem:[#allocation5_spill] sm:$0xff] %v2673_v23  ;;  %3086 = vst [vmem:[#allocation11_spill] sm:$0xff] %v2682_v59  ;;  %v2703_v59 = vmul.f32 0.5, %v2471_v17  ;;  %v2722_v23 = vmul.f32 0.5, %v2491_v29 }
 0x1b2   :  { %3087 = vst [vmem:[#allocation8_spill] sm:$0xff] %v2685_v20  ;;  %3088 = vst [vmem:[#allocation10_spill] sm:$0xff] %v2688_v1  ;;  %v2706_v20 = vmul.f32 0.5, %v2475_v9  ;;  %v2709_v1 = vmul.f32 0.5, %v2479_v16 }
 0x1b3   :  { %3089 = vst [vmem:[#allocation16_spill] sm:$0xff] %v2691_v21  ;;  %3090 = vst [vmem:[#allocation29_spill] sm:$0xff] %v2694_v31  ;;  %v918_v21 = vmul.f32 0.70710677, %v2395_v54  ;;  %v2714_v31 = vmul.f32 0.5, %v2483_v8 }
 0x1b4   :  { %3091 = vst [vmem:[#allocation30_spill] sm:$0xff] %v2697_v25  ;;  %3092 = vst [vmem:[#allocation31_spill] sm:$0xff] %v2700_v5  ;;  %v2717_v25 = vmul.f32 0.5, %v2487_v37  ;;  %v920_v5 = vmul.f32 0.70710677, %v2403_v33  ;;  %v2736_v33 = vmul.f32 0.5, %v2507_v51 }
 0x1b5   :  { %3093 = vst [vmem:[#allocation32_spill] sm:$0xff] %v2703_v59  ;;  %3094 = vst [vmem:[#allocation33_spill] sm:$0xff] %v2706_v20  ;;  %v921_v59 = vmul.f32 0.70710677, %v2407_v15  ;;  %v2725_v20 = vmul.f32 0.5, %v2495_v7  ;;  %1399 = verf.f32 %v918_v21  ;;  %v2739_v15 = vmul.f32 0.5, %v2511_v47 }
 0x1b6   :  { %3095 = vst [vmem:[#allocation34_spill] sm:$0xff] %v2714_v31  ;;  %3096 = vst [vmem:[#allocation35_spill] sm:$0xff] %v2717_v25  ;;  %v922_v54 = vmul.f32 0.70710677, %v2411_v14  ;;  %v2732_v31 = vmul.f32 0.5, %v2503_v28  ;;  %1401 = verf.f32 %v919_v11  ;;  %v2743_v14 = vmul.f32 0.5, %v2515_v42 }
 0x1b7   :  { %3097 = vst [vmem:[#allocation36_spill] sm:$0xff] %v2725_v20  ;;  %v923_v25 = vmul.f32 0.70710677, %v2415_v24  ;;  %3099 = vst [vmem:[#allocation38_spill] sm:$0xff] %v2736_v33  ;;  %v924_v20 = vmul.f32 0.70710677, %v2419_v62  ;;  %1403 = verf.f32 %v920_v5 }
 0x1b8   :  { %3098 = vst [vmem:[#allocation37_spill] sm:$0xff] %v2732_v31  ;;  %3100 = vst [vmem:[#allocation39_spill] sm:$0xff] %v2739_v15  ;;  %v2746_v21 = vmul.f32 0.5, %v2519_v10  ;;  %v925_v31 = vmul.f32 0.70710677, %v2423_v13  ;;  %1405 = verf.f32 %v921_v59  ;;  %v2750_v24 = vmul.f32 0.5, %v2523_v58 }
 0x1b9   :  { %3101 = vst [vmem:[#allocation40_spill] sm:$0xff] %v2743_v14  ;;  %v2753_v11 = vmul.f32 0.5, %v2527_v32  ;;  %v926_v15 = vmul.f32 0.70710677, %v2427_v19  ;;  %1407 = verf.f32 %v922_v54  ;;  %v2757_v62 = vmul.f32 0.5, %v2531_v35 }
 0x1ba   :  { %3102 = vst [vmem:[#allocation41_spill] sm:$0xff] %v2746_v21  ;;  %3103 = vst [vmem:[#allocation42_spill] sm:$0xff] %v2750_v24  ;;  %v2760_v5 = vmul.f32 0.5, %v2535_v0  ;;  %v927_v21 = vmul.f32 0.70710677, %v2431_v3  ;;  %1409 = verf.f32 %v923_v25  ;;  %v2764_v13 = vmul.f32 0.5, %v2539_v2 }
 0x1bb   :  { %3104 = vst [vmem:[#allocation43_spill] sm:$0xff] %v2753_v11  ;;  %3105 = vst [vmem:[#allocation44_spill] sm:$0xff] %v2757_v62  ;;  %v2767_v59 = vmul.f32 0.5, %v2543_v27  ;;  %v928_v11 = vmul.f32 0.70710677, %v2435_v39  ;;  %1411 = verf.f32 %v924_v20  ;;  %v2771_v19 = vmul.f32 0.5, %v2547_v44 }
 0x1bc   :  { %3106 = vst [vmem:[#allocation45_spill] sm:$0xff] %v2760_v5  ;;  %3107 = vst [vmem:[#allocation46_spill] sm:$0xff] %v2764_v13  ;;  %v2774_v54 = vmul.f32 0.5, %v2551_v43  ;;  %v929_v5 = vmul.f32 0.70710677, %v2439_v41  ;;  %1413 = verf.f32 %v925_v31  ;;  %v2778_v3 = vmul.f32 0.5, %v2555_v34 }
 0x1bd   :  { %3108 = vst [vmem:[#allocation47_spill] sm:$0xff] %v2767_v59  ;;  %3109 = vst [vmem:[#allocation48_spill] sm:$0xff] %v2771_v19  ;;  %v2781_v25 = vmul.f32 0.5, %v2559_v57  ;;  %v930_v59 = vmul.f32 0.70710677, %v2443_v38  ;;  %1415 = verf.f32 %v926_v15  ;;  %v2785_v39 = vmul.f32 0.5, %v2563_v36 }
 0x1be   :  { %3110 = vst [vmem:[#allocation49_spill] sm:$0xff] %v2774_v54  ;;  %3111 = vst [vmem:[#allocation50_spill] sm:$0xff] %v2778_v3  ;;  %v2788_v20 = vmul.f32 0.5, %v2567_v49  ;;  %v931_v54 = vmul.f32 0.70710677, %v2447_v40  ;;  %1417 = verf.f32 %v927_v21  ;;  %v2792_v31 = vmul.f32 0.5, %v2571_v55 }
 0x1bf   :  { %3112 = vst [vmem:[#allocation51_spill] sm:$0xff] %v2781_v25  ;;  %3113 = vst [vmem:[#allocation52_spill] sm:$0xff] %v2785_v39  ;;  %v1400_v41 = vpop.eup %1399  ;;  %v2795_v3 = vmul.f32 0.5, %v2575_v45  ;;  %v932_v25 = vmul.f32 0.70710677, %v2451_v56  ;;  %1419 = verf.f32 %v928_v11  ;;  %v3117_v15 = vld [vmem:[#allocation18_spill] sm:$0xff] }
 0x1c0   :  { %3114 = vst [vmem:[#allocation53_spill] sm:$0xff] %v2788_v20  ;;  %3115 = vst [vmem:[#allocation54_spill] sm:$0xff] %v2792_v31  ;;  %v1402_v38 = vpop.eup %1401  ;;  %v2799_v19 = vmul.f32 0.5, %v3117_v15  ;;  %v3119_v39 = vld [vmem:[#allocation14_spill] sm:$0xff]  ;;  %v933_v40 = vmul.f32 0.70710677, %v2455_v61  ;;  %1421 = verf.f32 %v929_v5 }
 0x1c1   :  { %3116 = vst [vmem:[#allocation55_spill] sm:$0xff] %v2795_v3  ;;  %v2802_v13 = vmul.f32 0.5, %v3119_v39  ;;  %v1404_v21 = vpop.eup %1403  ;;  %v934_v20 = vmul.f32 0.70710677, %v2459_v53  ;;  %v935_v31 = vmul.f32 0.70710677, %v2463_v60  ;;  %1423 = verf.f32 %v930_v59 }
 0x1c2   :  { %3118 = vst [vmem:[#allocation56_spill] sm:$0xff] %v2799_v19  ;;  %v936_v3 = vmul.f32 0.70710677, %v2467_v12  ;;  %v1406_v56 = vpop.eup %1405  ;;  %v937_v11 = vmul.f32 0.70710677, %v2471_v17  ;;  %1425 = verf.f32 %v931_v54 }
 0x1c3   :  { %3120 = vst [vmem:[#allocation57_spill] sm:$0xff] %v2802_v13  ;;  %v938_v62 = vmul.f32 0.70710677, %v2475_v9  ;;  %v939_v19 = vmul.f32 0.70710677, %v2479_v16  ;;  %v1408_v13 = vpop.eup %1407  ;;  %1427 = verf.f32 %v932_v25 }
 0x1c4   :  { %v940_v61 = vmul.f32 0.70710677, %v2483_v8  ;;  %v941_v5 = vmul.f32 0.70710677, %v2487_v37  ;;  %v942_v53 = vmul.f32 0.70710677, %v2491_v29  ;;  %v1410_v60 = vpop.eup %1409  ;;  %1429 = verf.f32 %v933_v40 }
 0x1c5   :  { %v943_v12 = vmul.f32 0.70710677, %v2495_v7  ;;  %v944_v59 = vmul.f32 0.70710677, %v2499_v30  ;;  %v945_v17 = vmul.f32 0.70710677, %v2503_v28  ;;  %v1412_v9 = vpop.eup %1411  ;;  %1431 = verf.f32 %v934_v20 }
 0x1c6   :  { %v2818_v16 = vmul.f32 0.70710677, %v2507_v51  ;;  %v2821_v54 = vmul.f32 0.70710677, %v2511_v47  ;;  %v2824_v8 = vmul.f32 0.70710677, %v2515_v42  ;;  %v1414_v37 = vpop.eup %1413  ;;  %1433 = verf.f32 %v935_v31 }
 0x1c7   :  { %v2827_v29 = vmul.f32 0.70710677, %v2519_v10  ;;  %v2830_v7 = vmul.f32 0.70710677, %v2523_v58  ;;  %v2833_v30 = vmul.f32 0.70710677, %v2527_v32  ;;  %v1416_v28 = vpop.eup %1415  ;;  %1435 = verf.f32 %v936_v3 }
 0x1c8   :  { %v2836_v51 = vmul.f32 0.70710677, %v2531_v35  ;;  %v2839_v47 = vmul.f32 0.70710677, %v2535_v0  ;;  %v2842_v42 = vmul.f32 0.70710677, %v2539_v2  ;;  %v1418_v10 = vpop.eup %1417  ;;  %1437 = verf.f32 %v937_v11 }
 0x1c9   :  { %v2845_v25 = vmul.f32 0.70710677, %v2543_v27  ;;  %v1046_v58 = vadd.f32 1.0, %v1400_v41  ;;  %v1047_v32 = vadd.f32 1.0, %v1402_v38  ;;  %v1420_v20 = vpop.eup %1419  ;;  %1439 = verf.f32 %v938_v62 }
 0x1ca   :  { %v1048_v31 = vadd.f32 1.0, %v1404_v21  ;;  %v1049_v40 = vadd.f32 1.0, %v1406_v56  ;;  %v1050_v35 = vadd.f32 1.0, %v1408_v13  ;;  %v1422_v24 = vpop.eup %1421  ;;  %1441 = verf.f32 %v939_v19 }
 0x1cb   :  { %v1051_v0 = vadd.f32 1.0, %v1410_v60  ;;  %v1052_v14 = vadd.f32 1.0, %v1412_v9  ;;  %v1053_v39 = vadd.f32 1.0, %v1414_v37  ;;  %v1424_v2 = vpop.eup %1423  ;;  %1443 = verf.f32 %v940_v61 }
 0x1cc   :  { %v1054_v3 = vadd.f32 1.0, %v1416_v28  ;;  %v1055_v15 = vadd.f32 1.0, %v1418_v10  ;;  %v1056_v33 = vadd.f32 1.0, %v1420_v20  ;;  %v1426_v27 = vpop.eup %1425  ;;  %1445 = verf.f32 %v941_v5  ;;  %v3126_v20 = vld [vmem:[#allocation10_spill] sm:$0xff] }
 0x1cd   :  { %v1057_v11 = vadd.f32 1.0, %v1422_v24  ;;  %v1058_v41 = vadd.f32 1.0, %v1424_v2  ;;  %v1110_v38 = vmul.f32 %v1046_v58, %v2646_v50  ;;  %v1428_v62 = vpop.eup %1427  ;;  %1447 = verf.f32 %v942_v53 }
 0x1ce   :  { %v1059_v21 = vadd.f32 1.0, %v1426_v27  ;;  %v1111_v13 = vmul.f32 %v1047_v32, %v2649_v48  ;;  %v1112_v19 = vmul.f32 %v1048_v31, %v2652_v26  ;;  %v1430_v56 = vpop.eup %1429  ;;  %1449 = verf.f32 %v943_v12  ;;  %v3125_v32 = vld [vmem:[#allocation8_spill] sm:$0xff]  ;;  %v3129_v27 = vld [vmem:[#allocation30_spill] sm:$0xff] }
 0x1cf   :  { %v1060_v60 = vadd.f32 1.0, %v1428_v62  ;;  %v1113_v61 = vmul.f32 %v1049_v40, %v2655_v52  ;;  %v1114_v9 = vmul.f32 %v1050_v35, %v2658_v6  ;;  %1174 = vst [vmem:[#allocation2] sm:$0xff] %v1110_v38  ;;  %v1432_v5 = vpop.eup %1431  ;;  %1451 = verf.f32 %v944_v59  ;;  %v3121_v59 = vld [vmem:[#allocation5_spill] sm:$0xff]  ;;  %v3127_v40 = vld [vmem:[#allocation16_spill] sm:$0xff] }
 0x1d0   :  { %v1061_v24 = vadd.f32 1.0, %v1430_v56  ;;  %v1115_v50 = vmul.f32 %v1051_v0, %v2661_v63  ;;  %v1116_v53 = vmul.f32 %v1052_v14, %v2664_v18  ;;  %1175 = vst [vmem:[#allocation2 + $0x8] sm:$0xff] %v1111_v13  ;;  %1176 = vst [vmem:[#allocation2 + $0x10] sm:$0xff] %v1112_v19  ;;  %v1434_v48 = vpop.eup %1433  ;;  %1453 = verf.f32 %v945_v17  ;;  %v3122_v63 = vld [vmem:[#allocation6_spill] sm:$0xff]  ;;  %v3123_v17 = vld [vmem:[#allocation9_spill] sm:$0xff] }
 0x1d1   :  { %v1062_v26 = vadd.f32 1.0, %v1432_v5  ;;  %v1117_v12 = vmul.f32 %v1053_v39, %v2667_v46  ;;  %v1118_v37 = vmul.f32 %v1054_v3, %v2670_v4  ;;  %1177 = vst [vmem:[#allocation2 + $0x18] sm:$0xff] %v1113_v61  ;;  %1178 = vst [vmem:[#allocation2 + $0x20] sm:$0xff] %v1114_v9  ;;  %v1436_v6 = vpop.eup %1435  ;;  %1455 = verf.f32 %v2818_v16  ;;  %v3124_v39 = vld [vmem:[#allocation11_spill] sm:$0xff]  ;;  %v3128_v0 = vld [vmem:[#allocation29_spill] sm:$0xff] }
 0x1d2   :  { %v1063_v52 = vadd.f32 1.0, %v1434_v48  ;;  %v1119_v28 = vmul.f32 %v1055_v15, %v3121_v59  ;;  %v1120_v10 = vmul.f32 %v1056_v33, %v3122_v63  ;;  %1179 = vst [vmem:[#allocation2 + $0x28] sm:$0xff] %v1115_v50  ;;  %1180 = vst [vmem:[#allocation2 + $0x30] sm:$0xff] %v1116_v53  ;;  %v1438_v18 = vpop.eup %1437  ;;  %1457 = verf.f32 %v2821_v54  ;;  %v3132_v19 = vld [vmem:[#allocation33_spill] sm:$0xff]  ;;  %v3133_v50 = vld [vmem:[#allocation34_spill] sm:$0xff] }
 0x1d3   :  { %v1064_v14 = vadd.f32 1.0, %v1436_v6  ;;  %v1121_v46 = vmul.f32 %v1057_v11, %v3123_v17  ;;  %v1122_v4 = vmul.f32 %v1058_v41, %v3124_v39  ;;  %1181 = vst [vmem:[#allocation2 + $0x38] sm:$0xff] %v1117_v12  ;;  %1182 = vst [vmem:[#allocation2 + $0x40] sm:$0xff] %v1118_v37  ;;  %v1440_v58 = vpop.eup %1439  ;;  %1459 = verf.f32 %v2824_v8  ;;  %v3130_v41 = vld [vmem:[#allocation31_spill] sm:$0xff]  ;;  %v3135_v59 = vld [vmem:[#allocation36_spill] sm:$0xff] }
 0x1d4   :  { %v1065_v16 = vadd.f32 1.0, %v1438_v18  ;;  %v1123_v15 = vmul.f32 %v1059_v21, %v3125_v32  ;;  %v1124_v33 = vmul.f32 %v1060_v60, %v3126_v20  ;;  %1183 = vst [vmem:[#allocation2 + $0x48] sm:$0xff] %v1119_v28  ;;  %1184 = vst [vmem:[#allocation2 + $0x50] sm:$0xff] %v1120_v10  ;;  %v1442_v31 = vpop.eup %1441  ;;  %1461 = verf.f32 %v2827_v29  ;;  %v3131_v21 = vld [vmem:[#allocation32_spill] sm:$0xff] }
 0x1d5   :  { %v1066_v54 = vadd.f32 1.0, %v1440_v58  ;;  %v1125_v35 = vmul.f32 %v1061_v24, %v3127_v40  ;;  %v1126_v2 = vmul.f32 %v1062_v26, %v3128_v0  ;;  %1185 = vst [vmem:[#allocation2 + $0x58] sm:$0xff] %v1121_v46  ;;  %1186 = vst [vmem:[#allocation2 + $0x60] sm:$0xff] %v1122_v4  ;;  %v1444_v3 = vpop.eup %1443  ;;  %1463 = verf.f32 %v2830_v7  ;;  %v3134_v26 = vld [vmem:[#allocation35_spill] sm:$0xff]  ;;  %v3137_v4 = vld [vmem:[#allocation38_spill] sm:$0xff] }
 0x1d6   :  { %v1067_v8 = vadd.f32 1.0, %v1442_v31  ;;  %v1127_v11 = vmul.f32 %v1063_v52, %v3129_v27  ;;  %v1128_v38 = vmul.f32 %v1064_v14, %v3130_v41  ;;  %1187 = vst [vmem:[#allocation2 + $0x68] sm:$0xff] %v1123_v15  ;;  %1188 = vst [vmem:[#allocation2 + $0x70] sm:$0xff] %v1124_v33  ;;  %v1446_v62 = vpop.eup %1445  ;;  %1465 = verf.f32 %v2833_v30  ;;  %v3136_v14 = vld [vmem:[#allocation37_spill] sm:$0xff]  ;;  %v3139_v15 = vld [vmem:[#allocation39_spill] sm:$0xff] }
 0x1d7   :  { %v1068_v29 = vadd.f32 1.0, %v1444_v3  ;;  %v1129_v13 = vmul.f32 %v1065_v16, %v3131_v21  ;;  %v1130_v56 = vmul.f32 %v1066_v54, %v3132_v19  ;;  %1189 = vst [vmem:[#allocation2 + $0x78] sm:$0xff] %v1125_v35  ;;  %1190 = vst [vmem:[#allocation2 + $0x80] sm:$0xff] %v1126_v2  ;;  %v1448_v60 = vpop.eup %1447  ;;  %v956_v7 = vmul.f32 0.70710677, %v2547_v44  ;;  %v3138_v16 = vld [vmem:[#allocation18_spill] sm:$0xff] }
 0x1d8   :  { %1467 = verf.f32 %v2836_v51  ;;  %v1069_v61 = vadd.f32 1.0, %v1446_v62  ;;  %v1131_v9 = vmul.f32 %v1067_v8, %v2709_v1  ;;  %1191 = vst [vmem:[#allocation2 + $0x88] sm:$0xff] %v1127_v11  ;;  %1192 = vst [vmem:[#allocation2 + $0x90] sm:$0xff] %v1128_v38  ;;  %v1450_v5 = vpop.eup %1449  ;;  %v957_v30 = vmul.f32 0.70710677, %v2551_v43  ;;  %v3140_v33 = vld [vmem:[#allocation14_spill] sm:$0xff] }
 0x1d9   :  { %1469 = verf.f32 %v2839_v47  ;;  %v1070_v24 = vadd.f32 1.0, %v1448_v60  ;;  %v1132_v53 = vmul.f32 %v1068_v29, %v3133_v50  ;;  %1193 = vst [vmem:[#allocation2 + $0x98] sm:$0xff] %v1129_v13  ;;  %1194 = vst [vmem:[#allocation2 + $0xa0] sm:$0xff] %v1130_v56  ;;  %v1452_v48 = vpop.eup %1451  ;;  %v958_v44 = vmul.f32 0.70710677, %v2555_v34  ;;  %v3141_v40 = vld [vmem:[#allocation40_spill] sm:$0xff] }
 0x1da   :  { %1471 = verf.f32 %v2842_v42  ;;  %v1071_v51 = vadd.f32 1.0, %v1450_v5  ;;  %v1133_v1 = vmul.f32 %v1069_v61, %v3134_v26  ;;  %1195 = vst [vmem:[#allocation2 + $0xa8] sm:$0xff] %v1131_v9  ;;  %v1454_v12 = vpop.eup %1453  ;;  %v959_v37 = vmul.f32 0.70710677, %v2559_v57  ;;  %v3142_v0 = vld [vmem:[#allocation17_spill] sm:$0xff]  ;;  %v3144_v41 = vld [vmem:[#allocation24_spill] sm:$0xff] }
 0x1db   :  { %1473 = verf.f32 %v2845_v25  ;;  %v1072_v43 = vadd.f32 1.0, %v1452_v48  ;;  %v1134_v47 = vmul.f32 %v1070_v24, %v2722_v23  ;;  %1196 = vst [vmem:[#allocation2 + $0xb0] sm:$0xff] %v1132_v53  ;;  %v1456_v6 = vpop.eup %1455  ;;  %v960_v52 = vmul.f32 0.70710677, %v2563_v36  ;;  %v3143_v8 = vld [vmem:[#allocation41_spill] sm:$0xff]  ;;  %v3145_v29 = vld [vmem:[#allocation42_spill] sm:$0xff] }
 0x1dc   :  { %1475 = verf.f32 %v956_v7  ;;  %v1073_v34 = vadd.f32 1.0, %v1454_v12  ;;  %v1135_v42 = vmul.f32 %v1071_v51, %v3135_v59  ;;  %1197 = vst [vmem:[#allocation2 + $0xb8] sm:$0xff] %v1133_v1  ;;  %v1458_v28 = vpop.eup %1457  ;;  %v961_v63 = vmul.f32 0.70710677, %v2567_v49  ;;  %v3146_v19 = vld [vmem:[#allocation26_spill] sm:$0xff]  ;;  %v3147_v7 = vld [vmem:[#allocation43_spill] sm:$0xff] }
 0x1dd   :  { %1477 = verf.f32 %v957_v30  ;;  %v1074_v10 = vadd.f32 1.0, %v1456_v6  ;;  %v1136_v57 = vmul.f32 %v1072_v43, %v2729_v22  ;;  %1198 = vst [vmem:[#allocation2 + $0xc0] sm:$0xff] %v1134_v47  ;;  %v1460_v25 = vpop.eup %1459  ;;  %v962_v23 = vmul.f32 0.70710677, %v2571_v55  ;;  %v3148_v5 = vld [vmem:[#allocation22_spill] sm:$0xff]  ;;  %v3149_v50 = vld [vmem:[#allocation44_spill] sm:$0xff] }
 0x1de   :  { %1479 = verf.f32 %v958_v44  ;;  %v1075_v18 = vadd.f32 1.0, %v1458_v28  ;;  %v1137_v36 = vmul.f32 %v1073_v34, %v3136_v14  ;;  %1199 = vst [vmem:[#allocation2 + $0xc8] sm:$0xff] %v1135_v42  ;;  %v1462_v17 = vpop.eup %1461  ;;  %v963_v46 = vmul.f32 0.70710677, %v2575_v45  ;;  %v3150_v44 = vld [vmem:[#allocation25_spill] sm:$0xff]  ;;  %v3152_v43 = vld [vmem:[#allocation15_spill] sm:$0xff] }
 0x1df   :  { %1481 = verf.f32 %v959_v37  ;;  %v1076_v39 = vadd.f32 1.0, %v1460_v25  ;;  %v1138_v49 = vmul.f32 %v1074_v10, %v3137_v4  ;;  %1200 = vst [vmem:[#allocation2 + $0xd0] sm:$0xff] %v1136_v57  ;;  %v1464_v58 = vpop.eup %1463  ;;  %v964_v22 = vmul.f32 0.70710677, %v3138_v16  ;;  %v3151_v1 = vld [vmem:[#allocation45_spill] sm:$0xff]  ;;  %v3154_v42 = vld [vmem:[#allocation12_spill] sm:$0xff] }
 0x1e0   :  { %1483 = verf.f32 %v960_v52  ;;  %v1077_v32 = vadd.f32 1.0, %v1462_v17  ;;  %v1139_v55 = vmul.f32 %v1075_v18, %v3139_v15  ;;  %1201 = vst [vmem:[#allocation2 + $0xd8] sm:$0xff] %v1137_v36  ;;  %v1466_v20 = vpop.eup %1465  ;;  %v965_v31 = vmul.f32 0.70710677, %v3140_v33  ;;  %v3153_v52 = vld [vmem:[#allocation46_spill] sm:$0xff]  ;;  %v3155_v10 = vld [vmem:[#allocation47_spill] sm:$0xff] }
 0x1e1   :  { %1485 = verf.f32 %v961_v63  ;;  %v1078_v54 = vadd.f32 1.0, %v1464_v58  ;;  %v1140_v45 = vmul.f32 %v1076_v39, %v3141_v40  ;;  %1202 = vst [vmem:[#allocation2 + $0xe0] sm:$0xff] %v1138_v49  ;;  %v966_v2 = vmul.f32 0.70710677, %v3142_v0  ;;  %v3157_v36 = vld [vmem:[#allocation48_spill] sm:$0xff]  ;;  %v3159_v58 = vld [vmem:[#allocation49_spill] sm:$0xff] }
 0x1e2   :  { %v1468_v35 = vpop.eup %1467  ;;  %1487 = verf.f32 %v962_v23  ;;  %v1079_v3 = vadd.f32 1.0, %v1466_v20  ;;  %v1141_v27 = vmul.f32 %v1077_v32, %v3143_v8  ;;  %1203 = vst [vmem:[#allocation2 + $0xe8] sm:$0xff] %v1139_v55  ;;  %v967_v38 = vmul.f32 0.70710677, %v3144_v41  ;;  %v3156_v23 = vld [vmem:[#allocation13_spill] sm:$0xff]  ;;  %v3158_v39 = vld [vmem:[#allocation20_spill] sm:$0xff] }
 0x1e3   :  { %v1470_v11 = vpop.eup %1469  ;;  %1489 = verf.f32 %v963_v46  ;;  %v1080_v62 = vadd.f32 1.0, %v1468_v35  ;;  %v1142_v21 = vmul.f32 %v1078_v54, %v3145_v29  ;;  %1204 = vst [vmem:[#allocation2 + $0xf0] sm:$0xff] %v1140_v45  ;;  %v968_v56 = vmul.f32 0.70710677, %v3146_v19  ;;  %v3160_v32 = vld [vmem:[#allocation23_spill] sm:$0xff]  ;;  %v3161_v20 = vld [vmem:[#allocation50_spill] sm:$0xff] }
 0x1e4   :  { %v1472_v13 = vpop.eup %1471  ;;  %1491 = verf.f32 %v964_v22  ;;  %v1081_v60 = vadd.f32 1.0, %v1470_v11  ;;  %v1143_v61 = vmul.f32 %v1079_v3, %v3147_v7  ;;  %1205 = vst [vmem:[#allocation2 + $0xf8] sm:$0xff] %v1141_v27  ;;  %v969_v30 = vmul.f32 0.70710677, %v3148_v5  ;;  %v3162_v54 = vld [vmem:[#allocation19_spill] sm:$0xff]  ;;  %v3164_v8 = vld [vmem:[#allocation21_spill] sm:$0xff] }
 0x1e5   :  { %v1474_v9 = vpop.eup %1473  ;;  %1493 = verf.f32 %v965_v31  ;;  %v1082_v24 = vadd.f32 1.0, %v1472_v13  ;;  %v1144_v53 = vmul.f32 %v1080_v62, %v3149_v50  ;;  %1206 = vst [vmem:[#allocation2 + $0x100] sm:$0xff] %v1142_v21  ;;  %v970_v51 = vmul.f32 0.70710677, %v3150_v44  ;;  %v3163_v35 = vld [vmem:[#allocation51_spill] sm:$0xff]  ;;  %v3166_v21 = vld [vmem:[#allocation28_spill] sm:$0xff] }
 0x1e6   :  { %v1476_v48 = vpop.eup %1475  ;;  %1495 = verf.f32 %v966_v2  ;;  %v1083_v26 = vadd.f32 1.0, %v1474_v9  ;;  %v1145_v12 = vmul.f32 %v1081_v60, %v3151_v1  ;;  %1207 = vst [vmem:[#allocation2 + $0x108] sm:$0xff] %v1143_v61  ;;  %v971_v47 = vmul.f32 0.70710677, %v3152_v43  ;;  %v3167_v60 = vld [vmem:[#allocation53_spill] sm:$0xff]  ;;  %v3168_v9 = vld [vmem:[#allocation27_spill] sm:$0xff] }
 0x1e7   :  { %v1478_v37 = vpop.eup %1477  ;;  %1497 = verf.f32 %v967_v38  ;;  %v1084_v6 = vadd.f32 1.0, %v1476_v48  ;;  %v1146_v34 = vmul.f32 %v1082_v24, %v3153_v52  ;;  %1208 = vst [vmem:[#allocation2 + $0x110] sm:$0xff] %v1144_v53  ;;  %v972_v28 = vmul.f32 0.70710677, %v3154_v42  ;;  %v3165_v38 = vld [vmem:[#allocation52_spill] sm:$0xff]  ;;  %v3169_v50 = vld [vmem:[#allocation54_spill] sm:$0xff] }
 0x1e8   :  { %v1480_v59 = vpop.eup %1479  ;;  %1499 = verf.f32 %v968_v56  ;;  %v1085_v63 = vadd.f32 1.0, %v1478_v37  ;;  %v1147_v57 = vmul.f32 %v1083_v26, %v3155_v10  ;;  %1209 = vst [vmem:[#allocation2 + $0x118] sm:$0xff] %v1145_v12  ;;  %v973_v18 = vmul.f32 0.70710677, %v3156_v23  ;;  %v3171_v12 = vld [vmem:[#allocation55_spill] sm:$0xff] }
 0x1e9   :  { %v1482_v25 = vpop.eup %1481  ;;  %1501 = verf.f32 %v969_v30  ;;  %v1086_v14 = vadd.f32 1.0, %v1480_v59  ;;  %v1148_v17 = vmul.f32 %v1084_v6, %v3157_v36  ;;  %1210 = vst [vmem:[#allocation2 + $0x120] sm:$0xff] %v1146_v34  ;;  %v974_v4 = vmul.f32 0.70710677, %v3158_v39  ;;  %v3172_v34 = vld [vmem:[#allocation56_spill] sm:$0xff] }
 0x1ea   :  { %v1484_v46 = vpop.eup %1483  ;;  %1503 = verf.f32 %v970_v51  ;;  %v1087_v49 = vadd.f32 1.0, %v1482_v25  ;;  %v1149_v16 = vmul.f32 %v1085_v63, %v3159_v58  ;;  %1211 = vst [vmem:[#allocation2 + $0x128] sm:$0xff] %v1147_v57  ;;  %v975_v15 = vmul.f32 0.70710677, %v3160_v32  ;;  %v3170_v51 = vld [vmem:[#allocation7_spill] sm:$0xff]  ;;  %v3173_v57 = vld [vmem:[#allocation57_spill] sm:$0xff] }
 0x1eb   :  { %v1486_v22 = vpop.eup %1485  ;;  %1505 = verf.f32 %v971_v47  ;;  %v1088_v55 = vadd.f32 1.0, %v1484_v46  ;;  %v1150_v33 = vmul.f32 %v1086_v14, %v3161_v20  ;;  %1212 = vst [vmem:[#allocation2 + $0x130] sm:$0xff] %v1148_v17  ;;  %v976_v40 = vmul.f32 0.70710677, %v3162_v54 }
 0x1ec   :  { %v1488_v31 = vpop.eup %1487  ;;  %1507 = verf.f32 %v972_v28  ;;  %v1089_v45 = vadd.f32 1.0, %v1486_v22  ;;  %v1151_v2 = vmul.f32 %v1087_v49, %v3163_v35  ;;  %1213 = vst [vmem:[#allocation2 + $0x138] sm:$0xff] %v1149_v16  ;;  %v977_v27 = vmul.f32 0.70710677, %v3164_v8 }
 0x1ed   :  { %v1490_v3 = vpop.eup %1489  ;;  %1509 = verf.f32 %v973_v18  ;;  %v1090_v11 = vadd.f32 1.0, %v1488_v31  ;;  %v1152_v62 = vmul.f32 %v1088_v55, %v3165_v38  ;;  %1214 = vst [vmem:[#allocation2 + $0x140] sm:$0xff] %v1150_v33  ;;  %v978_v13 = vmul.f32 0.70710677, %v3166_v21 }
 0x1ee   :  { %v1492_v29 = vpop.eup %1491  ;;  %1511 = verf.f32 %v974_v4  ;;  %v1091_v56 = vadd.f32 1.0, %v1490_v3  ;;  %v1153_v7 = vmul.f32 %v1089_v45, %v3167_v60  ;;  %1215 = vst [vmem:[#allocation2 + $0x148] sm:$0xff] %v1151_v2  ;;  %v980_v30 = vmul.f32 0.70710677, %v3168_v9 }
 0x1ef   :  { %v1494_v61 = vpop.eup %1493  ;;  %1513 = verf.f32 %v975_v15  ;;  %v1092_v24 = vadd.f32 1.0, %v1492_v29  ;;  %v1154_v53 = vmul.f32 %v1090_v11, %v3169_v50  ;;  %1216 = vst [vmem:[#allocation2 + $0x150] sm:$0xff] %v1152_v62  ;;  %v981_v26 = vmul.f32 0.70710677, %v3170_v51 }
 0x1f0   :  { %v1496_v48 = vpop.eup %1495  ;;  %1515 = verf.f32 %v976_v40  ;;  %v1093_v1 = vadd.f32 1.0, %v1494_v61  ;;  %v1155_v37 = vmul.f32 %v1091_v56, %v3171_v12  ;;  %1217 = vst [vmem:[#allocation2 + $0x158] sm:$0xff] %v1153_v7  ;;  %v902_v6 = vmul.f32 0.5, %v3142_v0 }
 0x1f1   :  { %v1498_v47 = vpop.eup %1497  ;;  %1517 = verf.f32 %v977_v27  ;;  %v1094_v52 = vadd.f32 1.0, %v1496_v48  ;;  %v1156_v59 = vmul.f32 %v1092_v24, %v3172_v34  ;;  %1218 = vst [vmem:[#allocation2 + $0x160] sm:$0xff] %v1154_v53  ;;  %v903_v63 = vmul.f32 0.5, %v3144_v41 }
 0x1f2   :  { %v1500_v28 = vpop.eup %1499  ;;  %1519 = verf.f32 %v978_v13  ;;  %v1095_v10 = vadd.f32 1.0, %v1498_v47  ;;  %v1157_v25 = vmul.f32 %v1093_v1, %v3173_v57  ;;  %1219 = vst [vmem:[#allocation2 + $0x168] sm:$0xff] %v1155_v37  ;;  %v904_v14 = vmul.f32 0.5, %v3146_v19 }
 0x1f3   :  { %v1502_v18 = vpop.eup %1501  ;;  %1521 = verf.f32 %v980_v30  ;;  %v1096_v36 = vadd.f32 1.0, %v1500_v28  ;;  %v1158_v17 = vmul.f32 %v1094_v52, %v902_v6  ;;  %1220 = vst [vmem:[#allocation2 + $0x170] sm:$0xff] %v1156_v59  ;;  %v905_v46 = vmul.f32 0.5, %v3148_v5 }
 0x1f4   :  { %v1504_v0 = vpop.eup %1503  ;;  %1523 = verf.f32 %v981_v26  ;;  %v1097_v4 = vadd.f32 1.0, %v1502_v18  ;;  %v1159_v49 = vmul.f32 %v1095_v10, %v903_v63  ;;  %1221 = vst [vmem:[#allocation2 + $0x178] sm:$0xff] %v1157_v25  ;;  %v906_v58 = vmul.f32 0.5, %v3150_v44 }
 0x1f5   :  { %v1506_v41 = vpop.eup %1505  ;;  %v1098_v16 = vadd.f32 1.0, %v1504_v0  ;;  %v1160_v22 = vmul.f32 %v1096_v36, %v904_v14  ;;  %1222 = vst [vmem:[#allocation2 + $0x180] sm:$0xff] %v1158_v17  ;;  %v907_v19 = vmul.f32 0.5, %v3152_v43  ;;  %v908_v31 = vmul.f32 0.5, %v3154_v42 }
 0x1f6   :  { %v1508_v15 = vpop.eup %1507  ;;  %v1099_v55 = vadd.f32 1.0, %v1506_v41  ;;  %v1161_v20 = vmul.f32 %v1097_v4, %v905_v46  ;;  %1223 = vst [vmem:[#allocation2 + $0x188] sm:$0xff] %v1159_v49  ;;  %v909_v35 = vmul.f32 0.5, %v3156_v23  ;;  %v910_v27 = vmul.f32 0.5, %v3158_v39 }
 0x1f7   :  { %v1510_v33 = vpop.eup %1509  ;;  %v1100_v5 = vadd.f32 1.0, %v1508_v15  ;;  %v1162_v40 = vmul.f32 %v1098_v16, %v906_v58  ;;  %1224 = vst [vmem:[#allocation2 + $0x190] sm:$0xff] %v1160_v22  ;;  %v911_v62 = vmul.f32 0.5, %v3160_v32  ;;  %v912_v56 = vmul.f32 0.5, %v3162_v54 }
 0x1f8   :  { %v1512_v45 = vpop.eup %1511  ;;  %v1101_v2 = vadd.f32 1.0, %v1510_v33  ;;  %v1163_v44 = vmul.f32 %v1099_v55, %v907_v19  ;;  %1225 = vst [vmem:[#allocation2 + $0x198] sm:$0xff] %v1161_v20  ;;  %v913_v61 = vmul.f32 0.5, %v3164_v8  ;;  %v914_v50 = vmul.f32 0.5, %v3166_v21 }
 0x1f9   :  { %v1514_v3 = vpop.eup %1513  ;;  %v1102_v11 = vadd.f32 1.0, %v1512_v45  ;;  %v1164_v43 = vmul.f32 %v1100_v5, %v908_v31  ;;  %1226 = vst [vmem:[#allocation2 + $0x1a0] sm:$0xff] %v1162_v40  ;;  %v916_v54 = vmul.f32 0.5, %v3168_v9  ;;  %v917_v12 = vmul.f32 0.5, %v3170_v51 }
 0x1fa   :  { %v1516_v38 = vpop.eup %1515  ;;  %v1103_v29 = vadd.f32 1.0, %v1514_v3  ;;  %v1165_v42 = vmul.f32 %v1101_v2, %v909_v35  ;;  %1227 = vst [vmem:[#allocation2 + $0x1a8] sm:$0xff] %v1163_v44 }
 0x1fb   :  { %v1518_v13 = vpop.eup %1517  ;;  %v1104_v60 = vadd.f32 1.0, %v1516_v38  ;;  %v1166_v23 = vmul.f32 %v1102_v11, %v910_v27  ;;  %1228 = vst [vmem:[#allocation2 + $0x1b0] sm:$0xff] %v1164_v43 }
 0x1fc   :  { %v1520_v7 = vpop.eup %1519  ;;  %v1105_v30 = vadd.f32 1.0, %v1518_v13  ;;  %v1167_v39 = vmul.f32 %v1103_v29, %v911_v62  ;;  %1229 = vst [vmem:[#allocation2 + $0x1b8] sm:$0xff] %v1165_v42 }
 0x1fd   :  { %v1522_v24 = vpop.eup %1521  ;;  %v1106_v53 = vadd.f32 1.0, %v1520_v7  ;;  %v1168_v32 = vmul.f32 %v1104_v60, %v912_v56  ;;  %1230 = vst [vmem:[#allocation2 + $0x1c0] sm:$0xff] %v1166_v23 }
 0x1fe   :  { %v1524_v48 = vpop.eup %1523  ;;  %v1108_v26 = vadd.f32 1.0, %v1522_v24  ;;  %v1169_v1 = vmul.f32 %v1105_v30, %v913_v61  ;;  %1231 = vst [vmem:[#allocation2 + $0x1c8] sm:$0xff] %v1167_v39 }
 0x1ff   :  { %v1109_v8 = vadd.f32 1.0, %v1524_v48  ;;  %v1170_v37 = vmul.f32 %v1106_v53, %v914_v50  ;;  %1232 = vst [vmem:[#allocation2 + $0x1d0] sm:$0xff] %v1168_v32 }
 0x200   :  { %v1172_v47 = vmul.f32 %v1108_v26, %v916_v54  ;;  %1233 = vst [vmem:[#allocation2 + $0x1d8] sm:$0xff] %v1169_v1 }
 0x201   :  { %v1173_v21 = vmul.f32 %v1109_v8, %v917_v12  ;;  %1234 = vst [vmem:[#allocation2 + $0x1e0] sm:$0xff] %v1170_v37 }
 0x202   :  { %1236 = vst [vmem:[#allocation2 + $0x1f0] sm:$0xff] %v1172_v47 }
 0x203   :  { %1237 = vst [vmem:[#allocation2 + $0x1f8] sm:$0xff] %v1173_v21 }
 0x204   :  { %1536 = shalt.err (!%p1533_p4)
}
 0x205   :  { %s1537_s15 = scalar_lea.hbm %s2960_s3, 8192 }
 0x206   :  { %p1538_p5 = scmp.ne.s32.totalorder %s2960_s3, %s1537_s15  ;;  %p1541_p6 = scmp.lt.u32.totalorder %s1537_s15, %s2960_s3 }
 0x208   :  { %p1543_p7 = pnand %p1541_p6, %p1538_p5 }
 0x20a   :  { %1546 = shalt.err (!%p1543_p7)
}
 0x20b   :  { %s1550_s20 = smov 128   ;;  %s1551_s21 = smov 8  }
 0x20c   :  { %1249 = dma.vmem_to_hbm [thread:$0]  %s1244_s11, 8192, %s2960_s3, [#allocation3], %s1550_s20, %s1550_s20, %s1551_s21  }
 0x20d   :  { %1547 = dma.done.wait [#allocation3], 8192  }
 0x20e   :  { %1548 = vsyncadd [#allocation3], 4294959104 }
 0x20f   :  { %1253 = vsyncpa [#allocation3], 1 }

</bundles_post_ra>
